<compile_context>
chip_gen: v6e
topology: v6e:2x2x1
jax: 0.10.0
libtpu: 0.0.40
codegen_flags: <defaults>
</compile_context>

<pallas_src>
import math

import jax
import jax.numpy as jnp
from jax import lax
from jax.experimental import pallas as pl
from jax.experimental.pallas import tpu as pltpu


# ----------------------------- LSTM kernel -----------------------------

def _lstm_kernel(macro_ref, h0_ref, c0_ref, wih_ref, whh_ref, b_ref,
                 hall_ref, gx_ref):
    """macro_ref: (T*B, Dm) time-major rows.  hall_ref out: (T*B, H) time-major."""
    TB = macro_ref.shape[0]
    B, H = h0_ref.shape
    T = TB // B

    wih = wih_ref[...]            # (Dm, 4H)
    whh = whh_ref[...]            # (H, 4H) fused gates (i,f,g,o)
    b_lstm = b_ref[...]           # (1, 4H) = b_ih + b_hh

    # Input projection for ALL timesteps in one matmul (off the serial path).
    gx_ref[...] = (jnp.dot(macro_ref[...], wih, preferred_element_type=jnp.float32)
                   + b_lstm)

    def step(t, carry):
        h, c = carry                                                    # (B, H) each
        g = (gx_ref[pl.ds(t * B, B), :]
             + jnp.dot(h, whh, preferred_element_type=jnp.float32))     # (B, 4H)
        gi = jax.nn.sigmoid(g[:, 0 * H:1 * H])
        gf = jax.nn.sigmoid(g[:, 1 * H:2 * H])
        gg = jnp.tanh(g[:, 2 * H:3 * H])
        go = jax.nn.sigmoid(g[:, 3 * H:4 * H])
        c = gf * c + gi * gg
        h = go * jnp.tanh(c)
        hall_ref[pl.ds(t * B, B), :] = h          # one contiguous (B, H) store / step
        return (h, c)

    lax.fori_loop(0, T, step, (h0_ref[...], c0_ref[...]), unroll=(T <= 16))


# ----------------------------- MLP kernel -----------------------------

def _mlp_kernel(ind_ref, hall_ref, w1i_ref, w1m_ref, b1_ref, w2_ref, b2_ref,
                w3_ref, b3_ref, out_ref):
    """Per grid step: TBT (b,t)-groups x N assets of the fused dense network."""
    TBT, H = hall_ref.shape
    rows = ind_ref.shape[0]
    N = rows // TBT
    H1 = w1m_ref.shape[1]

    # Hoist all weight/bias loads (single read per grid step).
    w1i = w1i_ref[...]
    w1m = w1m_ref[...]
    b1 = b1_ref[...]
    w2 = w2_ref[...]
    b2 = b2_ref[...]
    w3 = w3_ref[...]
    b3 = b3_ref[...]

    # Macro half of layer 1, computed once per (b,t) row, then broadcast over the
    # N assets of each group (implements torch.tile + concat with zero extra MXU work).
    z_mac = jnp.dot(hall_ref[...], w1m, preferred_element_type=jnp.float32) + b1   # (TBT, H1)
    z_mac_b = jnp.broadcast_to(z_mac[:, None, :], (TBT, N, H1)).reshape(rows, H1)

    z1 = jnp.dot(ind_ref[...], w1i, preferred_element_type=jnp.float32) + z_mac_b  # (rows, H1)
    a1 = jnp.maximum(z1, 0.0)
    a2 = jnp.maximum(jnp.dot(a1, w2, preferred_element_type=jnp.float32) + b2, 0.0)
    out = jnp.dot(a2, w3, preferred_element_type=jnp.float32) + b3
    # TODO(synk): for large production M, emit a lane-dense (M-on-lanes / transposed)
    # output slab instead of the (rows, 1) masked store.
    out_ref[...] = out.astype(out_ref.dtype)


# ----------------------------- wrapper -----------------------------

def _choose_tile_bt(bt, n, target_rows=512):
    """Tile (in (b,t)-rows) per grid step.  Must be BT itself or a multiple of 8
    dividing BT so every BlockSpec satisfies the (8,128) divisibility rule."""
    if bt * n <= 2 * target_rows:
        return bt
    best = bt
    for cand in range(8, bt, 8):
        if bt % cand == 0 and cand * n <= 2 * target_rows:
            best = cand
    return best


def feature_extraction_forward(params, macro_features, individual_features, masks,
                               returns_tensor, hidden_state):
    """config.use_rnn = True -> LSTM; masks=None path (all entries kept)."""
    # TODO(synk): torch.masked_select + reshape((1, masks.sum(), D)) produces a
    # data-dependent output shape; only the masks=None path is implemented.
    del masks, returns_tensor
    h0, c0 = hidden_state
    B, T, D_macro = macro_features.shape
    N, D_ind = individual_features.shape[2], individual_features.shape[3]
    H = h0.shape[-1]
    BT = B * T
    M = BT * N
    H1 = params["w1_mac"].shape[1]
    H2 = params["w2"].shape[1]
    O = params["w3"].shape[1]

    # ---- Kernel 1: LSTM over time (tiny; all operands VMEM resident) ----
    macro_tm = jnp.swapaxes(macro_features, 0, 1).reshape(T * B, D_macro)   # time-major rows
    hall_tm = pl.pallas_call(
        _lstm_kernel,
        out_shape=jax.ShapeDtypeStruct((T * B, H), jnp.float32),
        scratch_shapes=[pltpu.VMEM((T * B, 4 * H), jnp.float32)],           # hoisted gate proj
    )(macro_tm, h0, c0, params["wih"], params["whh"], params["b_lstm"])

    # (T*B, H) time-major -> (B*T, H) (b,t)-major; tiny XLA transpose in HBM.
    hall_bt = hall_tm.reshape(T, B, H).transpose(1, 0, 2).reshape(BT, H)

    # ---- Kernel 2: dense MLP gridded over the (b,t) axis ----
    ind2d = individual_features.reshape(M, D_ind)      # rows ordered (b, t, n) — free reshape
    TBT = _choose_tile_bt(BT, N)
    n_tiles = BT // TBT
    rows_per_tile = TBT * N

    out = pl.pallas_call(
        _mlp_kernel,
        out_shape=jax.ShapeDtypeStruct((M, O), jnp.float32),
        grid_spec=pltpu.PrefetchScalarGridSpec(
            num_scalar_prefetch=0,
            grid=(n_tiles,),
            in_specs=[
                pl.BlockSpec((rows_per_tile, D_ind), lambda i: (i, 0)),   # individual rows
                pl.BlockSpec((TBT, H), lambda i: (i, 0)),                 # macro (LSTM) rows
                pl.BlockSpec((D_ind, H1), lambda i: (0, 0)),              # w1_ind
                pl.BlockSpec((H, H1), lambda i: (0, 0)),                  # w1_mac
                pl.BlockSpec((1, H1), lambda i: (0, 0)),                  # b1
                pl.BlockSpec((H1, H2), lambda i: (0, 0)),                 # w2
                pl.BlockSpec((1, H2), lambda i: (0, 0)),                  # b2
                pl.BlockSpec((H2, O), lambda i: (0, 0)),                  # w3
                pl.BlockSpec((1, O), lambda i: (0, 0)),                   # b3
            ],
            out_specs=pl.BlockSpec((rows_per_tile, O), lambda i: (i, 0)),
        ),
        compiler_params=pltpu.CompilerParams(
            dimension_semantics=("parallel",)),          # shards across TCs on v7x
    )(ind2d, hall_bt,
      params["w1_ind"], params["w1_mac"], params["b1"],
      params["w2"], params["b2"], params["w3"], params["b3"])

    return out.reshape(B, T, N, O)


# ----------------------------- params -----------------------------

def init_params(key, d_macro, rnn_hidden, d_ind, hidden_sizes, output_size):
    ks = jax.random.split(key, 10)
    s_lstm = 1.0 / math.sqrt(rnn_hidden)
    d_in = d_ind + rnn_hidden
    h1, h2 = hidden_sizes

    def u(k, shape, s):
        return jax.random.uniform(k, shape, jnp.float32, -s, s)

    return dict(
        wih=u(ks[0], (d_macro, 4 * rnn_hidden), s_lstm),           # W_ih^T, gate order i,f,g,o
        whh=u(ks[1], (rnn_hidden, 4 * rnn_hidden), s_lstm),        # W_hh^T, fused gates
        b_lstm=u(ks[2], (1, 4 * rnn_hidden), s_lstm),              # b_ih + b_hh
        w1_ind=u(ks[3], (d_ind, h1), 1.0 / math.sqrt(d_in)),       # W1[:d_ind, :]
        w1_mac=u(ks[4], (rnn_hidden, h1), 1.0 / math.sqrt(d_in)),  # W1[d_ind:, :]
        b1=u(ks[5], (1, h1), 1.0 / math.sqrt(d_in)),
        w2=u(ks[6], (h1, h2), 1.0 / math.sqrt(h1)),
        b2=u(ks[7], (1, h2), 1.0 / math.sqrt(h1)),
        w3=u(ks[8], (h2, output_size), 1.0 / math.sqrt(h2)),
        b3=u(ks[9], (1, output_size), 1.0 / math.sqrt(h2)),
    )


# ----------------------------- pure-JAX reference -----------------------------

def _reference_forward(params, macro, individual, hidden_state):
    h0, c0 = hidden_state
    H = h0.shape[-1]

    def step(carry, x_t):
        h, c = carry
        gates = x_t @ params["wih"] + h @ params["whh"] + params["b_lstm"]
        i = jax.nn.sigmoid(gates[:, 0 * H:1 * H])
        f = jax.nn.sigmoid(gates[:, 1 * H:2 * H])
        g = jnp.tanh(gates[:, 2 * H:3 * H])
        o = jax.nn.sigmoid(gates[:, 3 * H:4 * H])
        c = f * c + i * g
        h = o * jnp.tanh(c)
        return (h, c), h

    _, hs = jax.lax.scan(step, (h0, c0), jnp.transpose(macro, (1, 0, 2)))
    macro_proc = jnp.transpose(hs, (1, 0, 2))                            # (B, T, H)
    N = individual.shape[2]
    dense_in = jnp.concatenate(
        [individual, jnp.tile(macro_proc[:, :, None, :], (1, 1, N, 1))], axis=-1)
    w1 = jnp.concatenate([params["w1_ind"], params["w1_mac"]], axis=0)
    h = jnp.maximum(dense_in @ w1 + params["b1"], 0.0)
    h = jnp.maximum(h @ params["w2"] + params["b2"], 0.0)
    return h @ params["w3"] + params["b3"]


# ----------------------------- main -----------------------------

if __name__ == "__main__":
    B, T, N = 1, 8, 16
    D_MACRO, RNN_HIDDEN, D_IND = 8, 16, 24
    HIDDEN_SIZES = (32, 16)
    OUTPUT_SIZE = 1

    key = jax.random.PRNGKey(0)
    k_params, k_macro, k_ind, k_ret = jax.random.split(key, 4)

    params = init_params(k_params, D_MACRO, RNN_HIDDEN, D_IND, HIDDEN_SIZES, OUTPUT_SIZE)

    macro_features = jax.random.normal(k_macro, (B, T, D_MACRO), jnp.float32)
    individual_features = jax.random.normal(k_ind, (B, T, N, D_IND), jnp.float32)
    returns_tensor = jax.random.normal(k_ret, (B, T, N, 1), jnp.float32)
    masks = None
    hidden_state = (jnp.zeros((B, RNN_HIDDEN), jnp.float32),
                    jnp.zeros((B, RNN_HIDDEN), jnp.float32))

    fwd = jax.jit(feature_extraction_forward)
    out = fwd(params, macro_features, individual_features, masks, returns_tensor,
              hidden_state)
    out = jax.block_until_ready(out)
    assert out.shape == (B, T, N, OUTPUT_SIZE), out.shape

    ref = _reference_forward(params, macro_features, individual_features, hidden_state)
    max_err = float(jnp.max(jnp.abs(out - ref)))
    assert jnp.allclose(out, ref, rtol=1e-4, atol=2e-4), max_err

    print("KERNEL_OK")
</pallas_src>

<mosaic_0001>
module attributes {stable_mosaic.version = 11 : i64} {
  func.func @_lstm_kernel(%arg0: memref<8x8xf32, #tpu.memory_space<vmem>>, %arg1: memref<1x16xf32, #tpu.memory_space<vmem>>, %arg2: memref<1x16xf32, #tpu.memory_space<vmem>>, %arg3: memref<8x64xf32, #tpu.memory_space<vmem>>, %arg4: memref<16x64xf32, #tpu.memory_space<vmem>>, %arg5: memref<1x64xf32, #tpu.memory_space<vmem>>, %arg6: memref<8x16xf32, #tpu.memory_space<vmem>>, %arg7: memref<8x64xf32, #tpu.memory_space<vmem>>) attributes {dimension_semantics = [], scalar_prefetch = 0 : i64, scratch_operands = 1 : i64, tpu.core_type = #tpu.core_type<tc>} {
    %c0 = arith.constant 0 : index
    %c0_0 = arith.constant 0 : index
    %0 = vector.load %arg3[%c0, %c0_0] : memref<8x64xf32, #tpu.memory_space<vmem>>, vector<8x64xf32>
    %c0_1 = arith.constant 0 : index
    %c0_2 = arith.constant 0 : index
    %1 = vector.load %arg4[%c0_1, %c0_2] : memref<16x64xf32, #tpu.memory_space<vmem>>, vector<16x64xf32>
    %c0_3 = arith.constant 0 : index
    %c0_4 = arith.constant 0 : index
    %2 = vector.load %arg5[%c0_3, %c0_4] : memref<1x64xf32, #tpu.memory_space<vmem>>, vector<1x64xf32>
    %c0_5 = arith.constant 0 : index
    %c0_6 = arith.constant 0 : index
    %3 = vector.load %arg0[%c0_5, %c0_6] : memref<8x8xf32, #tpu.memory_space<vmem>>, vector<8x8xf32>
    %cst = arith.constant dense<0.000000e+00> : vector<8x64xf32>
    %4 = tpu.matmul %3, %0, %cst {dimension_numbers = #tpu.dot_dimension_numbers<[1], [0], [0], [1], [0, 0, 1, 1], [], []>} : vector<8x8xf32>, vector<8x64xf32>, vector<8x64xf32> -> vector<8x64xf32>
    %5 = vector.broadcast %2 : vector<1x64xf32> to vector<8x64xf32>
    %6 = arith.addf %4, %5 : vector<8x64xf32>
    %c0_7 = arith.constant 0 : index
    %c0_8 = arith.constant 0 : index
    %7 = vector.load %arg7[%c0_7, %c0_8] : memref<8x64xf32, #tpu.memory_space<vmem>>, vector<8x64xf32>
    tpu.vector_store %arg7[%c0_7, %c0_8], %6 {strides = array<i32>} : memref<8x64xf32, #tpu.memory_space<vmem>>, vector<8x64xf32>,
    %c0_9 = arith.constant 0 : index
    %c0_10 = arith.constant 0 : index
    %8 = vector.load %arg1[%c0_9, %c0_10] : memref<1x16xf32, #tpu.memory_space<vmem>>, vector<1x16xf32>
    %c0_11 = arith.constant 0 : index
    %c0_12 = arith.constant 0 : index
    %9 = vector.load %arg2[%c0_11, %c0_12] : memref<1x16xf32, #tpu.memory_space<vmem>>, vector<1x16xf32>
    %c0_i32 = arith.constant 0 : i32
    %c1_i32 = arith.constant 1 : i32
    %10 = arith.muli %c0_i32, %c1_i32 : i32
    %11 = arith.index_cast %10 : i32 to index
    %c0_13 = arith.constant 0 : index
    %12 = vector.load %arg7[%11, %c0_13] : memref<8x64xf32, #tpu.memory_space<vmem>>, vector<1x64xf32>
    %cst_14 = arith.constant dense<0.000000e+00> : vector<1x64xf32>
    %13 = tpu.matmul %8, %1, %cst_14 {dimension_numbers = #tpu.dot_dimension_numbers<[1], [0], [0], [1], [0, 0, 1, 1], [], []>} : vector<1x16xf32>, vector<16x64xf32>, vector<1x64xf32> -> vector<1x64xf32>
    %14 = arith.addf %12, %13 : vector<1x64xf32>
    %15 = vector.extract_strided_slice %14 {offsets = [0, 0], sizes = [1, 16], strides = [1, 1]} : vector<1x64xf32> to vector<1x16xf32>
    %16 = arith.negf %15 : vector<1x16xf32>
    %17 = math.exp %16 : vector<1x16xf32>
    %cst_15 = arith.constant 1.000000e+00 : f32
    %18 = vector.broadcast %cst_15 : f32 to vector<1x16xf32>
    %19 = arith.addf %18, %17 : vector<1x16xf32>
    %20 = arith.divf %18, %19 : vector<1x16xf32>
    %21 = vector.extract_strided_slice %14 {offsets = [0, 16], sizes = [1, 16], strides = [1, 1]} : vector<1x64xf32> to vector<1x16xf32>
    %22 = arith.negf %21 : vector<1x16xf32>
    %23 = math.exp %22 : vector<1x16xf32>
    %cst_16 = arith.constant 1.000000e+00 : f32
    %24 = vector.broadcast %cst_16 : f32 to vector<1x16xf32>
    %25 = arith.addf %24, %23 : vector<1x16xf32>
    %26 = arith.divf %24, %25 : vector<1x16xf32>
    %27 = vector.extract_strided_slice %14 {offsets = [0, 32], sizes = [1, 16], strides = [1, 1]} : vector<1x64xf32> to vector<1x16xf32>
    %28 = math.tanh %27 : vector<1x16xf32>
    %29 = vector.extract_strided_slice %14 {offsets = [0, 48], sizes = [1, 16], strides = [1, 1]} : vector<1x64xf32> to vector<1x16xf32>
    %30 = arith.negf %29 : vector<1x16xf32>
    %31 = math.exp %30 : vector<1x16xf32>
    %cst_17 = arith.constant 1.000000e+00 : f32
    %32 = vector.broadcast %cst_17 : f32 to vector<1x16xf32>
    %33 = arith.addf %32, %31 : vector<1x16xf32>
    %34 = arith.divf %32, %33 : vector<1x16xf32>
    %35 = arith.mulf %26, %9 : vector<1x16xf32>
    %36 = arith.mulf %20, %28 : vector<1x16xf32>
    %37 = arith.addf %35, %36 : vector<1x16xf32>
    %38 = math.tanh %37 : vector<1x16xf32>
    %39 = arith.mulf %34, %38 : vector<1x16xf32>
    %c1_i32_18 = arith.constant 1 : i32
    %40 = arith.muli %c0_i32, %c1_i32_18 : i32
    %41 = arith.index_cast %40 : i32 to index
    %c0_19 = arith.constant 0 : index
    %42 = vector.load %arg6[%41, %c0_19] : memref<8x16xf32, #tpu.memory_space<vmem>>, vector<1x16xf32>
    tpu.vector_store %arg6[%41, %c0_19], %39 {strides = array<i32>} : memref<8x16xf32, #tpu.memory_space<vmem>>, vector<1x16xf32>,
    %c1_i32_20 = arith.constant 1 : i32
    %c1_i32_21 = arith.constant 1 : i32
    %43 = arith.muli %c1_i32_20, %c1_i32_21 : i32
    %44 = arith.index_cast %43 : i32 to index
    %c0_22 = arith.constant 0 : index
    %45 = vector.load %arg7[%44, %c0_22] : memref<8x64xf32, #tpu.memory_space<vmem>>, vector<1x64xf32>
    %cst_23 = arith.constant dense<0.000000e+00> : vector<1x64xf32>
    %46 = tpu.matmul %39, %1, %cst_23 {dimension_numbers = #tpu.dot_dimension_numbers<[1], [0], [0], [1], [0, 0, 1, 1], [], []>} : vector<1x16xf32>, vector<16x64xf32>, vector<1x64xf32> -> vector<1x64xf32>
    %47 = arith.addf %45, %46 : vector<1x64xf32>
    %48 = vector.extract_strided_slice %47 {offsets = [0, 0], sizes = [1, 16], strides = [1, 1]} : vector<1x64xf32> to vector<1x16xf32>
    %49 = arith.negf %48 : vector<1x16xf32>
    %50 = math.exp %49 : vector<1x16xf32>
    %cst_24 = arith.constant 1.000000e+00 : f32
    %51 = vector.broadcast %cst_24 : f32 to vector<1x16xf32>
    %52 = arith.addf %51, %50 : vector<1x16xf32>
    %53 = arith.divf %51, %52 : vector<1x16xf32>
    %54 = vector.extract_strided_slice %47 {offsets = [0, 16], sizes = [1, 16], strides = [1, 1]} : vector<1x64xf32> to vector<1x16xf32>
    %55 = arith.negf %54 : vector<1x16xf32>
    %56 = math.exp %55 : vector<1x16xf32>
    %cst_25 = arith.constant 1.000000e+00 : f32
    %57 = vector.broadcast %cst_25 : f32 to vector<1x16xf32>
    %58 = arith.addf %57, %56 : vector<1x16xf32>
    %59 = arith.divf %57, %58 : vector<1x16xf32>
    %60 = vector.extract_strided_slice %47 {offsets = [0, 32], sizes = [1, 16], strides = [1, 1]} : vector<1x64xf32> to vector<1x16xf32>
    %61 = math.tanh %60 : vector<1x16xf32>
    %62 = vector.extract_strided_slice %47 {offsets = [0, 48], sizes = [1, 16], strides = [1, 1]} : vector<1x64xf32> to vector<1x16xf32>
    %63 = arith.negf %62 : vector<1x16xf32>
    %64 = math.exp %63 : vector<1x16xf32>
    %cst_26 = arith.constant 1.000000e+00 : f32
    %65 = vector.broadcast %cst_26 : f32 to vector<1x16xf32>
    %66 = arith.addf %65, %64 : vector<1x16xf32>
    %67 = arith.divf %65, %66 : vector<1x16xf32>
    %68 = arith.mulf %59, %37 : vector<1x16xf32>
    %69 = arith.mulf %53, %61 : vector<1x16xf32>
    %70 = arith.addf %68, %69 : vector<1x16xf32>
    %71 = math.tanh %70 : vector<1x16xf32>
    %72 = arith.mulf %67, %71 : vector<1x16xf32>
    %c1_i32_27 = arith.constant 1 : i32
    %73 = arith.muli %c1_i32_20, %c1_i32_27 : i32
    %74 = arith.index_cast %73 : i32 to index
    %c0_28 = arith.constant 0 : index
    %75 = vector.load %arg6[%74, %c0_28] : memref<8x16xf32, #tpu.memory_space<vmem>>, vector<1x16xf32>
    tpu.vector_store %arg6[%74, %c0_28], %72 {strides = array<i32>} : memref<8x16xf32, #tpu.memory_space<vmem>>, vector<1x16xf32>,
    %c2_i32 = arith.constant 2 : i32
    %c1_i32_29 = arith.constant 1 : i32
    %76 = arith.muli %c2_i32, %c1_i32_29 : i32
    %77 = arith.index_cast %76 : i32 to index
    %c0_30 = arith.constant 0 : index
    %78 = vector.load %arg7[%77, %c0_30] : memref<8x64xf32, #tpu.memory_space<vmem>>, vector<1x64xf32>
    %cst_31 = arith.constant dense<0.000000e+00> : vector<1x64xf32>
    %79 = tpu.matmul %72, %1, %cst_31 {dimension_numbers = #tpu.dot_dimension_numbers<[1], [0], [0], [1], [0, 0, 1, 1], [], []>} : vector<1x16xf32>, vector<16x64xf32>, vector<1x64xf32> -> vector<1x64xf32>
    %80 = arith.addf %78, %79 : vector<1x64xf32>
    %81 = vector.extract_strided_slice %80 {offsets = [0, 0], sizes = [1, 16], strides = [1, 1]} : vector<1x64xf32> to vector<1x16xf32>
    %82 = arith.negf %81 : vector<1x16xf32>
    %83 = math.exp %82 : vector<1x16xf32>
    %cst_32 = arith.constant 1.000000e+00 : f32
    %84 = vector.broadcast %cst_32 : f32 to vector<1x16xf32>
    %85 = arith.addf %84, %83 : vector<1x16xf32>
    %86 = arith.divf %84, %85 : vector<1x16xf32>
    %87 = vector.extract_strided_slice %80 {offsets = [0, 16], sizes = [1, 16], strides = [1, 1]} : vector<1x64xf32> to vector<1x16xf32>
    %88 = arith.negf %87 : vector<1x16xf32>
    %89 = math.exp %88 : vector<1x16xf32>
    %cst_33 = arith.constant 1.000000e+00 : f32
    %90 = vector.broadcast %cst_33 : f32 to vector<1x16xf32>
    %91 = arith.addf %90, %89 : vector<1x16xf32>
    %92 = arith.divf %90, %91 : vector<1x16xf32>
    %93 = vector.extract_strided_slice %80 {offsets = [0, 32], sizes = [1, 16], strides = [1, 1]} : vector<1x64xf32> to vector<1x16xf32>
    %94 = math.tanh %93 : vector<1x16xf32>
    %95 = vector.extract_strided_slice %80 {offsets = [0, 48], sizes = [1, 16], strides = [1, 1]} : vector<1x64xf32> to vector<1x16xf32>
    %96 = arith.negf %95 : vector<1x16xf32>
    %97 = math.exp %96 : vector<1x16xf32>
    %cst_34 = arith.constant 1.000000e+00 : f32
    %98 = vector.broadcast %cst_34 : f32 to vector<1x16xf32>
    %99 = arith.addf %98, %97 : vector<1x16xf32>
    %100 = arith.divf %98, %99 : vector<1x16xf32>
    %101 = arith.mulf %92, %70 : vector<1x16xf32>
    %102 = arith.mulf %86, %94 : vector<1x16xf32>
    %103 = arith.addf %101, %102 : vector<1x16xf32>
    %104 = math.tanh %103 : vector<1x16xf32>
    %105 = arith.mulf %100, %104 : vector<1x16xf32>
    %c1_i32_35 = arith.constant 1 : i32
    %106 = arith.muli %c2_i32, %c1_i32_35 : i32
    %107 = arith.index_cast %106 : i32 to index
    %c0_36 = arith.constant 0 : index
    %108 = vector.load %arg6[%107, %c0_36] : memref<8x16xf32, #tpu.memory_space<vmem>>, vector<1x16xf32>
    tpu.vector_store %arg6[%107, %c0_36], %105 {strides = array<i32>} : memref<8x16xf32, #tpu.memory_space<vmem>>, vector<1x16xf32>,
    %c3_i32 = arith.constant 3 : i32
    %c1_i32_37 = arith.constant 1 : i32
    %109 = arith.muli %c3_i32, %c1_i32_37 : i32
    %110 = arith.index_cast %109 : i32 to index
    %c0_38 = arith.constant 0 : index
    %111 = vector.load %arg7[%110, %c0_38] : memref<8x64xf32, #tpu.memory_space<vmem>>, vector<1x64xf32>
    %cst_39 = arith.constant dense<0.000000e+00> : vector<1x64xf32>
    %112 = tpu.matmul %105, %1, %cst_39 {dimension_numbers = #tpu.dot_dimension_numbers<[1], [0], [0], [1], [0, 0, 1, 1], [], []>} : vector<1x16xf32>, vector<16x64xf32>, vector<1x64xf32> -> vector<1x64xf32>
    %113 = arith.addf %111, %112 : vector<1x64xf32>
    %114 = vector.extract_strided_slice %113 {offsets = [0, 0], sizes = [1, 16], strides = [1, 1]} : vector<1x64xf32> to vector<1x16xf32>
    %115 = arith.negf %114 : vector<1x16xf32>
    %116 = math.exp %115 : vector<1x16xf32>
    %cst_40 = arith.constant 1.000000e+00 : f32
    %117 = vector.broadcast %cst_40 : f32 to vector<1x16xf32>
    %118 = arith.addf %117, %116 : vector<1x16xf32>
    %119 = arith.divf %117, %118 : vector<1x16xf32>
    %120 = vector.extract_strided_slice %113 {offsets = [0, 16], sizes = [1, 16], strides = [1, 1]} : vector<1x64xf32> to vector<1x16xf32>
    %121 = arith.negf %120 : vector<1x16xf32>
    %122 = math.exp %121 : vector<1x16xf32>
    %cst_41 = arith.constant 1.000000e+00 : f32
    %123 = vector.broadcast %cst_41 : f32 to vector<1x16xf32>
    %124 = arith.addf %123, %122 : vector<1x16xf32>
    %125 = arith.divf %123, %124 : vector<1x16xf32>
    %126 = vector.extract_strided_slice %113 {offsets = [0, 32], sizes = [1, 16], strides = [1, 1]} : vector<1x64xf32> to vector<1x16xf32>
    %127 = math.tanh %126 : vector<1x16xf32>
    %128 = vector.extract_strided_slice %113 {offsets = [0, 48], sizes = [1, 16], strides = [1, 1]} : vector<1x64xf32> to vector<1x16xf32>
    %129 = arith.negf %128 : vector<1x16xf32>
    %130 = math.exp %129 : vector<1x16xf32>
    %cst_42 = arith.constant 1.000000e+00 : f32
    %131 = vector.broadcast %cst_42 : f32 to vector<1x16xf32>
    %132 = arith.addf %131, %130 : vector<1x16xf32>
    %133 = arith.divf %131, %132 : vector<1x16xf32>
    %134 = arith.mulf %125, %103 : vector<1x16xf32>
    %135 = arith.mulf %119, %127 : vector<1x16xf32>
    %136 = arith.addf %134, %135 : vector<1x16xf32>
    %137 = math.tanh %136 : vector<1x16xf32>
    %138 = arith.mulf %133, %137 : vector<1x16xf32>
    %c1_i32_43 = arith.constant 1 : i32
    %139 = arith.muli %c3_i32, %c1_i32_43 : i32
    %140 = arith.index_cast %139 : i32 to index
    %c0_44 = arith.constant 0 : index
    %141 = vector.load %arg6[%140, %c0_44] : memref<8x16xf32, #tpu.memory_space<vmem>>, vector<1x16xf32>
    tpu.vector_store %arg6[%140, %c0_44], %138 {strides = array<i32>} : memref<8x16xf32, #tpu.memory_space<vmem>>, vector<1x16xf32>,
    %c4_i32 = arith.constant 4 : i32
    %c1_i32_45 = arith.constant 1 : i32
    %142 = arith.muli %c4_i32, %c1_i32_45 : i32
    %143 = arith.index_cast %142 : i32 to index
    %c0_46 = arith.constant 0 : index
    %144 = vector.load %arg7[%143, %c0_46] : memref<8x64xf32, #tpu.memory_space<vmem>>, vector<1x64xf32>
    %cst_47 = arith.constant dense<0.000000e+00> : vector<1x64xf32>
    %145 = tpu.matmul %138, %1, %cst_47 {dimension_numbers = #tpu.dot_dimension_numbers<[1], [0], [0], [1], [0, 0, 1, 1], [], []>} : vector<1x16xf32>, vector<16x64xf32>, vector<1x64xf32> -> vector<1x64xf32>
    %146 = arith.addf %144, %145 : vector<1x64xf32>
    %147 = vector.extract_strided_slice %146 {offsets = [0, 0], sizes = [1, 16], strides = [1, 1]} : vector<1x64xf32> to vector<1x16xf32>
    %148 = arith.negf %147 : vector<1x16xf32>
    %149 = math.exp %148 : vector<1x16xf32>
    %cst_48 = arith.constant 1.000000e+00 : f32
    %150 = vector.broadcast %cst_48 : f32 to vector<1x16xf32>
    %151 = arith.addf %150, %149 : vector<1x16xf32>
    %152 = arith.divf %150, %151 : vector<1x16xf32>
    %153 = vector.extract_strided_slice %146 {offsets = [0, 16], sizes = [1, 16], strides = [1, 1]} : vector<1x64xf32> to vector<1x16xf32>
    %154 = arith.negf %153 : vector<1x16xf32>
    %155 = math.exp %154 : vector<1x16xf32>
    %cst_49 = arith.constant 1.000000e+00 : f32
    %156 = vector.broadcast %cst_49 : f32 to vector<1x16xf32>
    %157 = arith.addf %156, %155 : vector<1x16xf32>
    %158 = arith.divf %156, %157 : vector<1x16xf32>
    %159 = vector.extract_strided_slice %146 {offsets = [0, 32], sizes = [1, 16], strides = [1, 1]} : vector<1x64xf32> to vector<1x16xf32>
    %160 = math.tanh %159 : vector<1x16xf32>
    %161 = vector.extract_strided_slice %146 {offsets = [0, 48], sizes = [1, 16], strides = [1, 1]} : vector<1x64xf32> to vector<1x16xf32>
    %162 = arith.negf %161 : vector<1x16xf32>
    %163 = math.exp %162 : vector<1x16xf32>
    %cst_50 = arith.constant 1.000000e+00 : f32
    %164 = vector.broadcast %cst_50 : f32 to vector<1x16xf32>
    %165 = arith.addf %164, %163 : vector<1x16xf32>
    %166 = arith.divf %164, %165 : vector<1x16xf32>
    %167 = arith.mulf %158, %136 : vector<1x16xf32>
    %168 = arith.mulf %152, %160 : vector<1x16xf32>
    %169 = arith.addf %167, %168 : vector<1x16xf32>
    %170 = math.tanh %169 : vector<1x16xf32>
    %171 = arith.mulf %166, %170 : vector<1x16xf32>
    %c1_i32_51 = arith.constant 1 : i32
    %172 = arith.muli %c4_i32, %c1_i32_51 : i32
    %173 = arith.index_cast %172 : i32 to index
    %c0_52 = arith.constant 0 : index
    %174 = vector.load %arg6[%173, %c0_52] : memref<8x16xf32, #tpu.memory_space<vmem>>, vector<1x16xf32>
    tpu.vector_store %arg6[%173, %c0_52], %171 {strides = array<i32>} : memref<8x16xf32, #tpu.memory_space<vmem>>, vector<1x16xf32>,
    %c5_i32 = arith.constant 5 : i32
    %c1_i32_53 = arith.constant 1 : i32
    %175 = arith.muli %c5_i32, %c1_i32_53 : i32
    %176 = arith.index_cast %175 : i32 to index
    %c0_54 = arith.constant 0 : index
    %177 = vector.load %arg7[%176, %c0_54] : memref<8x64xf32, #tpu.memory_space<vmem>>, vector<1x64xf32>
    %cst_55 = arith.constant dense<0.000000e+00> : vector<1x64xf32>
    %178 = tpu.matmul %171, %1, %cst_55 {dimension_numbers = #tpu.dot_dimension_numbers<[1], [0], [0], [1], [0, 0, 1, 1], [], []>} : vector<1x16xf32>, vector<16x64xf32>, vector<1x64xf32> -> vector<1x64xf32>
    %179 = arith.addf %177, %178 : vector<1x64xf32>
    %180 = vector.extract_strided_slice %179 {offsets = [0, 0], sizes = [1, 16], strides = [1, 1]} : vector<1x64xf32> to vector<1x16xf32>
    %181 = arith.negf %180 : vector<1x16xf32>
    %182 = math.exp %181 : vector<1x16xf32>
    %cst_56 = arith.constant 1.000000e+00 : f32
    %183 = vector.broadcast %cst_56 : f32 to vector<1x16xf32>
    %184 = arith.addf %183, %182 : vector<1x16xf32>
    %185 = arith.divf %183, %184 : vector<1x16xf32>
    %186 = vector.extract_strided_slice %179 {offsets = [0, 16], sizes = [1, 16], strides = [1, 1]} : vector<1x64xf32> to vector<1x16xf32>
    %187 = arith.negf %186 : vector<1x16xf32>
    %188 = math.exp %187 : vector<1x16xf32>
    %cst_57 = arith.constant 1.000000e+00 : f32
    %189 = vector.broadcast %cst_57 : f32 to vector<1x16xf32>
    %190 = arith.addf %189, %188 : vector<1x16xf32>
    %191 = arith.divf %189, %190 : vector<1x16xf32>
    %192 = vector.extract_strided_slice %179 {offsets = [0, 32], sizes = [1, 16], strides = [1, 1]} : vector<1x64xf32> to vector<1x16xf32>
    %193 = math.tanh %192 : vector<1x16xf32>
    %194 = vector.extract_strided_slice %179 {offsets = [0, 48], sizes = [1, 16], strides = [1, 1]} : vector<1x64xf32> to vector<1x16xf32>
    %195 = arith.negf %194 : vector<1x16xf32>
    %196 = math.exp %195 : vector<1x16xf32>
    %cst_58 = arith.constant 1.000000e+00 : f32
    %197 = vector.broadcast %cst_58 : f32 to vector<1x16xf32>
    %198 = arith.addf %197, %196 : vector<1x16xf32>
    %199 = arith.divf %197, %198 : vector<1x16xf32>
    %200 = arith.mulf %191, %169 : vector<1x16xf32>
    %201 = arith.mulf %185, %193 : vector<1x16xf32>
    %202 = arith.addf %200, %201 : vector<1x16xf32>
    %203 = math.tanh %202 : vector<1x16xf32>
    %204 = arith.mulf %199, %203 : vector<1x16xf32>
    %c1_i32_59 = arith.constant 1 : i32
    %205 = arith.muli %c5_i32, %c1_i32_59 : i32
    %206 = arith.index_cast %205 : i32 to index
    %c0_60 = arith.constant 0 : index
    %207 = vector.load %arg6[%206, %c0_60] : memref<8x16xf32, #tpu.memory_space<vmem>>, vector<1x16xf32>
    tpu.vector_store %arg6[%206, %c0_60], %204 {strides = array<i32>} : memref<8x16xf32, #tpu.memory_space<vmem>>, vector<1x16xf32>,
    %c6_i32 = arith.constant 6 : i32
    %c1_i32_61 = arith.constant 1 : i32
    %208 = arith.muli %c6_i32, %c1_i32_61 : i32
    %209 = arith.index_cast %208 : i32 to index
    %c0_62 = arith.constant 0 : index
    %210 = vector.load %arg7[%209, %c0_62] : memref<8x64xf32, #tpu.memory_space<vmem>>, vector<1x64xf32>
    %cst_63 = arith.constant dense<0.000000e+00> : vector<1x64xf32>
    %211 = tpu.matmul %204, %1, %cst_63 {dimension_numbers = #tpu.dot_dimension_numbers<[1], [0], [0], [1], [0, 0, 1, 1], [], []>} : vector<1x16xf32>, vector<16x64xf32>, vector<1x64xf32> -> vector<1x64xf32>
    %212 = arith.addf %210, %211 : vector<1x64xf32>
    %213 = vector.extract_strided_slice %212 {offsets = [0, 0], sizes = [1, 16], strides = [1, 1]} : vector<1x64xf32> to vector<1x16xf32>
    %214 = arith.negf %213 : vector<1x16xf32>
    %215 = math.exp %214 : vector<1x16xf32>
    %cst_64 = arith.constant 1.000000e+00 : f32
    %216 = vector.broadcast %cst_64 : f32 to vector<1x16xf32>
    %217 = arith.addf %216, %215 : vector<1x16xf32>
    %218 = arith.divf %216, %217 : vector<1x16xf32>
    %219 = vector.extract_strided_slice %212 {offsets = [0, 16], sizes = [1, 16], strides = [1, 1]} : vector<1x64xf32> to vector<1x16xf32>
    %220 = arith.negf %219 : vector<1x16xf32>
    %221 = math.exp %220 : vector<1x16xf32>
    %cst_65 = arith.constant 1.000000e+00 : f32
    %222 = vector.broadcast %cst_65 : f32 to vector<1x16xf32>
    %223 = arith.addf %222, %221 : vector<1x16xf32>
    %224 = arith.divf %222, %223 : vector<1x16xf32>
    %225 = vector.extract_strided_slice %212 {offsets = [0, 32], sizes = [1, 16], strides = [1, 1]} : vector<1x64xf32> to vector<1x16xf32>
    %226 = math.tanh %225 : vector<1x16xf32>
    %227 = vector.extract_strided_slice %212 {offsets = [0, 48], sizes = [1, 16], strides = [1, 1]} : vector<1x64xf32> to vector<1x16xf32>
    %228 = arith.negf %227 : vector<1x16xf32>
    %229 = math.exp %228 : vector<1x16xf32>
    %cst_66 = arith.constant 1.000000e+00 : f32
    %230 = vector.broadcast %cst_66 : f32 to vector<1x16xf32>
    %231 = arith.addf %230, %229 : vector<1x16xf32>
    %232 = arith.divf %230, %231 : vector<1x16xf32>
    %233 = arith.mulf %224, %202 : vector<1x16xf32>
    %234 = arith.mulf %218, %226 : vector<1x16xf32>
    %235 = arith.addf %233, %234 : vector<1x16xf32>
    %236 = math.tanh %235 : vector<1x16xf32>
    %237 = arith.mulf %232, %236 : vector<1x16xf32>
    %c1_i32_67 = arith.constant 1 : i32
    %238 = arith.muli %c6_i32, %c1_i32_67 : i32
    %239 = arith.index_cast %238 : i32 to index
    %c0_68 = arith.constant 0 : index
    %240 = vector.load %arg6[%239, %c0_68] : memref<8x16xf32, #tpu.memory_space<vmem>>, vector<1x16xf32>
    tpu.vector_store %arg6[%239, %c0_68], %237 {strides = array<i32>} : memref<8x16xf32, #tpu.memory_space<vmem>>, vector<1x16xf32>,
    %c7_i32 = arith.constant 7 : i32
    %c1_i32_69 = arith.constant 1 : i32
    %241 = arith.muli %c7_i32, %c1_i32_69 : i32
    %242 = arith.index_cast %241 : i32 to index
    %c0_70 = arith.constant 0 : index
    %243 = vector.load %arg7[%242, %c0_70] : memref<8x64xf32, #tpu.memory_space<vmem>>, vector<1x64xf32>
    %cst_71 = arith.constant dense<0.000000e+00> : vector<1x64xf32>
    %244 = tpu.matmul %237, %1, %cst_71 {dimension_numbers = #tpu.dot_dimension_numbers<[1], [0], [0], [1], [0, 0, 1, 1], [], []>} : vector<1x16xf32>, vector<16x64xf32>, vector<1x64xf32> -> vector<1x64xf32>
    %245 = arith.addf %243, %244 : vector<1x64xf32>
    %246 = vector.extract_strided_slice %245 {offsets = [0, 0], sizes = [1, 16], strides = [1, 1]} : vector<1x64xf32> to vector<1x16xf32>
    %247 = arith.negf %246 : vector<1x16xf32>
    %248 = math.exp %247 : vector<1x16xf32>
    %cst_72 = arith.constant 1.000000e+00 : f32
    %249 = vector.broadcast %cst_72 : f32 to vector<1x16xf32>
    %250 = arith.addf %249, %248 : vector<1x16xf32>
    %251 = arith.divf %249, %250 : vector<1x16xf32>
    %252 = vector.extract_strided_slice %245 {offsets = [0, 16], sizes = [1, 16], strides = [1, 1]} : vector<1x64xf32> to vector<1x16xf32>
    %253 = arith.negf %252 : vector<1x16xf32>
    %254 = math.exp %253 : vector<1x16xf32>
    %cst_73 = arith.constant 1.000000e+00 : f32
    %255 = vector.broadcast %cst_73 : f32 to vector<1x16xf32>
    %256 = arith.addf %255, %254 : vector<1x16xf32>
    %257 = arith.divf %255, %256 : vector<1x16xf32>
    %258 = vector.extract_strided_slice %245 {offsets = [0, 32], sizes = [1, 16], strides = [1, 1]} : vector<1x64xf32> to vector<1x16xf32>
    %259 = math.tanh %258 : vector<1x16xf32>
    %260 = vector.extract_strided_slice %245 {offsets = [0, 48], sizes = [1, 16], strides = [1, 1]} : vector<1x64xf32> to vector<1x16xf32>
    %261 = arith.negf %260 : vector<1x16xf32>
    %262 = math.exp %261 : vector<1x16xf32>
    %cst_74 = arith.constant 1.000000e+00 : f32
    %263 = vector.broadcast %cst_74 : f32 to vector<1x16xf32>
    %264 = arith.addf %263, %262 : vector<1x16xf32>
    %265 = arith.divf %263, %264 : vector<1x16xf32>
    %266 = arith.mulf %257, %235 : vector<1x16xf32>
    %267 = arith.mulf %251, %259 : vector<1x16xf32>
    %268 = arith.addf %266, %267 : vector<1x16xf32>
    %269 = math.tanh %268 : vector<1x16xf32>
    %270 = arith.mulf %265, %269 : vector<1x16xf32>
    %c1_i32_75 = arith.constant 1 : i32
    %271 = arith.muli %c7_i32, %c1_i32_75 : i32
    %272 = arith.index_cast %271 : i32 to index
    %c0_76 = arith.constant 0 : index
    %273 = vector.load %arg6[%272, %c0_76] : memref<8x16xf32, #tpu.memory_space<vmem>>, vector<1x16xf32>
    tpu.vector_store %arg6[%272, %c0_76], %270 {strides = array<i32>} : memref<8x16xf32, #tpu.memory_space<vmem>>, vector<1x16xf32>,
    %c8_i32 = arith.constant 8 : i32
    return
  }
}

module attributes {stable_mosaic.version = 11 : i64} {
  func.func @_mlp_kernel(%arg0: i32, %arg1: memref<128x24xf32, #tpu.memory_space<vmem>>, %arg2: memref<8x16xf32, #tpu.memory_space<vmem>>, %arg3: memref<24x32xf32, #tpu.memory_space<vmem>>, %arg4: memref<16x32xf32, #tpu.memory_space<vmem>>, %arg5: memref<1x32xf32, #tpu.memory_space<vmem>>, %arg6: memref<32x16xf32, #tpu.memory_space<vmem>>, %arg7: memref<1x16xf32, #tpu.memory_space<vmem>>, %arg8: memref<16x1xf32, #tpu.memory_space<vmem>>, %arg9: memref<1x1xf32, #tpu.memory_space<vmem>>, %arg10: memref<128x1xf32, #tpu.memory_space<vmem>>) attributes {dimension_semantics = [#tpu.dimension_semantics<parallel>], iteration_bounds = array<i64: 1>, scalar_prefetch = 0 : i64, scratch_operands = 0 : i64, tpu.core_type = #tpu.core_type<tc>, window_params = [{transform_indices = @transform_0, window_bounds = array<i64: 128, 24>}, {transform_indices = @transform_1, window_bounds = array<i64: 8, 16>}, {pipeline_mode = #tpu.pipeline_mode<synchronous>, transform_indices = @transform_2, window_bounds = array<i64: 24, 32>}, {pipeline_mode = #tpu.pipeline_mode<synchronous>, transform_indices = @transform_3, window_bounds = array<i64: 16, 32>}, {pipeline_mode = #tpu.pipeline_mode<synchronous>, transform_indices = @transform_4, window_bounds = array<i64: 1, 32>}, {pipeline_mode = #tpu.pipeline_mode<synchronous>, transform_indices = @transform_5, window_bounds = array<i64: 32, 16>}, {pipeline_mode = #tpu.pipeline_mode<synchronous>, transform_indices = @transform_6, window_bounds = array<i64: 1, 16>}, {pipeline_mode = #tpu.pipeline_mode<synchronous>, transform_indices = @transform_7, window_bounds = array<i64: 16, 1>}, {pipeline_mode = #tpu.pipeline_mode<synchronous>, transform_indices = @transform_8, window_bounds = array<i64: 1, 1>}, {transform_indices = @transform_9, window_bounds = array<i64: 128, 1>}]} {
    %c0 = arith.constant 0 : index
    %c0_0 = arith.constant 0 : index
    %0 = vector.load %arg3[%c0, %c0_0] : memref<24x32xf32, #tpu.memory_space<vmem>>, vector<24x32xf32>
    %c0_1 = arith.constant 0 : index
    %c0_2 = arith.constant 0 : index
    %1 = vector.load %arg4[%c0_1, %c0_2] : memref<16x32xf32, #tpu.memory_space<vmem>>, vector<16x32xf32>
    %c0_3 = arith.constant 0 : index
    %c0_4 = arith.constant 0 : index
    %2 = vector.load %arg5[%c0_3, %c0_4] : memref<1x32xf32, #tpu.memory_space<vmem>>, vector<1x32xf32>
    %c0_5 = arith.constant 0 : index
    %c0_6 = arith.constant 0 : index
    %3 = vector.load %arg6[%c0_5, %c0_6] : memref<32x16xf32, #tpu.memory_space<vmem>>, vector<32x16xf32>
    %c0_7 = arith.constant 0 : index
    %c0_8 = arith.constant 0 : index
    %4 = vector.load %arg7[%c0_7, %c0_8] : memref<1x16xf32, #tpu.memory_space<vmem>>, vector<1x16xf32>
    %c0_9 = arith.constant 0 : index
    %c0_10 = arith.constant 0 : index
    %5 = vector.load %arg8[%c0_9, %c0_10] : memref<16x1xf32, #tpu.memory_space<vmem>>, vector<16x1xf32>
    %c0_11 = arith.constant 0 : index
    %c0_12 = arith.constant 0 : index
    %6 = vector.load %arg9[%c0_11, %c0_12] : memref<1x1xf32, #tpu.memory_space<vmem>>, vector<1x1xf32>
    %c0_13 = arith.constant 0 : index
    %c0_14 = arith.constant 0 : index
    %7 = vector.load %arg2[%c0_13, %c0_14] : memref<8x16xf32, #tpu.memory_space<vmem>>, vector<8x16xf32>
    %cst = arith.constant dense<0.000000e+00> : vector<8x32xf32>
    %8 = tpu.matmul %7, %1, %cst {dimension_numbers = #tpu.dot_dimension_numbers<[1], [0], [0], [1], [0, 0, 1, 1], [], []>} : vector<8x16xf32>, vector<16x32xf32>, vector<8x32xf32> -> vector<8x32xf32>
    %9 = vector.broadcast %2 : vector<1x32xf32> to vector<8x32xf32>
    %10 = arith.addf %8, %9 : vector<8x32xf32>
    %11 = vector.shape_cast %10 : vector<8x32xf32> to vector<8x1x32xf32>
    %12 = vector.shape_cast %11 : vector<8x1x32xf32> to vector<8x1x32xf32>
    %13 = vector.broadcast %12 : vector<8x1x32xf32> to vector<8x16x32xf32>
    %14 = vector.shape_cast %13 : vector<8x16x32xf32> to vector<128x32xf32>
    %c0_15 = arith.constant 0 : index
    %c0_16 = arith.constant 0 : index
    %15 = vector.load %arg1[%c0_15, %c0_16] : memref<128x24xf32, #tpu.memory_space<vmem>>, vector<128x24xf32>
    %cst_17 = arith.constant dense<0.000000e+00> : vector<128x32xf32>
    %16 = tpu.matmul %15, %0, %cst_17 {dimension_numbers = #tpu.dot_dimension_numbers<[1], [0], [0], [1], [0, 0, 1, 1], [], []>} : vector<128x24xf32>, vector<24x32xf32>, vector<128x32xf32> -> vector<128x32xf32>
    %17 = arith.addf %16, %14 : vector<128x32xf32>
    %cst_18 = arith.constant 0.000000e+00 : f32
    %18 = vector.broadcast %cst_18 : f32 to vector<128x32xf32>
    %19 = arith.maximumf %17, %18 : vector<128x32xf32>
    %cst_19 = arith.constant dense<0.000000e+00> : vector<128x16xf32>
    %20 = tpu.matmul %19, %3, %cst_19 {dimension_numbers = #tpu.dot_dimension_numbers<[1], [0], [0], [1], [0, 0, 1, 1], [], []>} : vector<128x32xf32>, vector<32x16xf32>, vector<128x16xf32> -> vector<128x16xf32>
    %21 = vector.broadcast %4 : vector<1x16xf32> to vector<128x16xf32>
    %22 = arith.addf %20, %21 : vector<128x16xf32>
    %cst_20 = arith.constant 0.000000e+00 : f32
    %23 = vector.broadcast %cst_20 : f32 to vector<128x16xf32>
    %24 = arith.maximumf %22, %23 : vector<128x16xf32>
    %cst_21 = arith.constant dense<0.000000e+00> : vector<128x1xf32>
    %25 = tpu.matmul %24, %5, %cst_21 {dimension_numbers = #tpu.dot_dimension_numbers<[1], [0], [0], [1], [0, 0, 1, 1], [], []>} : vector<128x16xf32>, vector<16x1xf32>, vector<128x1xf32> -> vector<128x1xf32>
    %26 = vector.broadcast %6 : vector<1x1xf32> to vector<128x1xf32>
    %27 = arith.addf %25, %26 : vector<128x1xf32>
    %c0_22 = arith.constant 0 : index
    %c0_23 = arith.constant 0 : index
    %28 = vector.load %arg10[%c0_22, %c0_23] : memref<128x1xf32, #tpu.memory_space<vmem>>, vector<128x1xf32>
    tpu.vector_store %arg10[%c0_22, %c0_23], %27 {strides = array<i32>} : memref<128x1xf32, #tpu.memory_space<vmem>>, vector<128x1xf32>,
    return
  }
  func.func @transform_0(%arg0: i32) -> (i32, i32) {
    %c0_i32 = arith.constant 0 : i32
    %c0_i32_0 = arith.constant 0 : i32
    return %arg0, %c0_i32 : i32, i32
  }
  func.func @transform_1(%arg0: i32) -> (i32, i32) {
    %c0_i32 = arith.constant 0 : i32
    %c0_i32_0 = arith.constant 0 : i32
    return %arg0, %c0_i32 : i32, i32
  }
  func.func @transform_2(%arg0: i32) -> (i32, i32) {
    %c0_i32 = arith.constant 0 : i32
    %c0_i32_0 = arith.constant 0 : i32
    %c0_i32_1 = arith.constant 0 : i32
    return %c0_i32, %c0_i32_0 : i32, i32
  }
  func.func @transform_3(%arg0: i32) -> (i32, i32) {
    %c0_i32 = arith.constant 0 : i32
    %c0_i32_0 = arith.constant 0 : i32
    %c0_i32_1 = arith.constant 0 : i32
    return %c0_i32, %c0_i32_0 : i32, i32
  }
  func.func @transform_4(%arg0: i32) -> (i32, i32) {
    %c0_i32 = arith.constant 0 : i32
    %c0_i32_0 = arith.constant 0 : i32
    %c0_i32_1 = arith.constant 0 : i32
    return %c0_i32, %c0_i32_0 : i32, i32
  }
  func.func @transform_5(%arg0: i32) -> (i32, i32) {
    %c0_i32 = arith.constant 0 : i32
    %c0_i32_0 = arith.constant 0 : i32
    %c0_i32_1 = arith.constant 0 : i32
    return %c0_i32, %c0_i32_0 : i32, i32
  }
  func.func @transform_6(%arg0: i32) -> (i32, i32) {
    %c0_i32 = arith.constant 0 : i32
    %c0_i32_0 = arith.constant 0 : i32
    %c0_i32_1 = arith.constant 0 : i32
    return %c0_i32, %c0_i32_0 : i32, i32
  }
  func.func @transform_7(%arg0: i32) -> (i32, i32) {
    %c0_i32 = arith.constant 0 : i32
    %c0_i32_0 = arith.constant 0 : i32
    %c0_i32_1 = arith.constant 0 : i32
    return %c0_i32, %c0_i32_0 : i32, i32
  }
  func.func @transform_8(%arg0: i32) -> (i32, i32) {
    %c0_i32 = arith.constant 0 : i32
    %c0_i32_0 = arith.constant 0 : i32
    %c0_i32_1 = arith.constant 0 : i32
    return %c0_i32, %c0_i32_0 : i32, i32
  }
  func.func @transform_9(%arg0: i32) -> (i32, i32) {
    %c0_i32 = arith.constant 0 : i32
    %c0_i32_0 = arith.constant 0 : i32
    return %arg0, %c0_i32 : i32, i32
  }
}

</mosaic_0001>

<bundles_post_ra>
// kernel: feature_extraction_forward.2
= control target key start
LH: loop header
LB: loop body
LE: loop exit
PB: predicated region body
PF: predicated region fallthrough
CT: control target
= control target key end

     0   :  { %11 = vsyncpa [#allocation4], 0  ;;  %s1464_s0 = inlined_call_operand.hbm [shape: f32[8,8], index: 0, kind: input, shape index: {}]   ;;  %s1465_s1 = inlined_call_operand.vmem [shape: f32[1,16], index: 1, kind: input, shape index: {}]   ;;  %s1466_s2 = inlined_call_operand.vmem [shape: f32[1,16], index: 2, kind: input, shape index: {}]   ;;  %s1467_s3 = inlined_call_operand.hbm [shape: f32[8,64], index: 3, kind: input, shape index: {}]   ;;  %s1468_s4 = inlined_call_operand.hbm [shape: f32[16,64], index: 4, kind: input, shape index: {}]   ;;  %s1469_s5 = inlined_call_operand.hbm [shape: f32[1,64], index: 5, kind: input, shape index: {}]   ;;  %s1470_s6 = inlined_call_operand.vmem [shape: f32[8,16], index: 6, kind: output, shape index: {}]  }
   0x1   :  { %12 = vsyncpa [#allocation6], 0 }
   0x2   :  { %13 = vsyncpa [#allocation9], 0  ;;  %s1271_s21 = smov [#allocation5]   ;;  %s1272_s23 = smov [#allocation3]  }
   0x3   :  { %s34_s22 = sshll.u32 %s1271_s21, 4  ;;  %s20_s24 = sshll.u32 %s1272_s23, 4  ;;  %s35_s22 = int_to_ptr.vmem [resolvable:$true] %s34_s22  ;;  %s21_s24 = int_to_ptr.vmem [resolvable:$true] %s20_s24 }
   0x4   :  { %s1193_s25 = scalar_lea.vmem %s35_s22, 128  ;;  %p1198_p1 = scmp.lt.s32.totalorder %s35_s22, %s35_s22 }
   0x5   :  { %p1194_p0 = scmp.ne.s32.totalorder %s35_s22, %s1193_s25  ;;  %p1199_p2 = scmp.lt.s32.totalorder %s1193_s25, %s1193_s25 }
   0x7   :  { %p1200_p3 = por %p1199_p2, %p1198_p1 }
   0x9   :  { %p1201_p4 = pnand %p1200_p3, %p1194_p0 }
   0xb   :  { %1204 = shalt.err (!%p1201_p4)
}
   0xc   :  { %37 = dma.hbm_to_vmem [thread:$0]  %s1467_s3, 128, %s35_s22, [#allocation6]  }
   0xd   :  { %s1213_s28 = scalar_lea.vmem %s21_s24, 128  ;;  %p1218_p6 = scmp.lt.s32.totalorder %s21_s24, %s21_s24 }
   0xe   :  { %p1214_p5 = scmp.ne.s32.totalorder %s21_s24, %s1213_s28  ;;  %p1219_p7 = scmp.lt.s32.totalorder %s1213_s28, %s1213_s28 }
  0x10   :  { %p1220_p8 = por %p1219_p7, %p1218_p6 }
  0x12   :  { %p1221_p9 = pnand %p1220_p8, %p1214_p5 }
  0x14   :  { %1224 = shalt.err (!%p1221_p9)
}
  0x15   :  { %23 = dma.hbm_to_vmem [thread:$0]  %s1464_s0, 128, %s21_s24, [#allocation4]  }
  0x16   :  { %s1273_s7 = smov [#allocation7]  }
  0x17   :  { %s43_s8 = sshll.u32 %s1273_s7, 4  ;;  %s44_s8 = int_to_ptr.vmem [resolvable:$true] %s43_s8 }
  0x18   :  { %s1233_s9 = scalar_lea.vmem %s44_s8, 256  ;;  %p1238_p11 = scmp.lt.s32.totalorder %s44_s8, %s44_s8 }
  0x19   :  { %p1234_p10 = scmp.ne.s32.totalorder %s44_s8, %s1233_s9  ;;  %p1239_p12 = scmp.lt.s32.totalorder %s1233_s9, %s1233_s9 }
  0x1b   :  { %p1240_p13 = por %p1239_p12, %p1238_p11 }
  0x1d   :  { %p1241_p0 = pnand %p1240_p13, %p1234_p10 }
  0x1f   :  { %1244 = shalt.err (!%p1241_p0)
}
  0x20   :  { %s1274_s3 = smov 128   ;;  %s1275_s10 = smov 8  }
  0x21   :  { %49 = dma.hbm_to_vmem [thread:$0]  %s1468_s4, 256, %s44_s8, [#allocation6], %s1274_s3, %s1274_s3, %s1275_s10  }
  0x22   :  { %s1276_s13 = smov [#allocation8]  }
  0x23   :  { %s56_s14 = sshll.u32 %s1276_s13, 4  ;;  %s57_s14 = int_to_ptr.vmem [resolvable:$true] %s56_s14 }
  0x24   :  { %s1253_s0 = scalar_lea.vmem %s57_s14, 16  ;;  %s1257_s15 = scalar_lea.vmem %s57_s14, 32 }
  0x25   :  { %p1254_p1 = scmp.ne.s32.totalorder %s57_s14, %s1253_s0  ;;  %p1258_p2 = scmp.lt.s32.totalorder %s57_s14, %s57_s14 }
  0x26   :  { %p1259_p3 = scmp.lt.s32.totalorder %s1257_s15, %s1253_s0 }
  0x28   :  { %p1260_p4 = por %p1259_p3, %p1258_p2 }
  0x2a   :  { %p1261_p5 = pnand %p1260_p4, %p1254_p1 }
  0x2c   :  { %1264 = shalt.err (!%p1261_p5)
}
  0x2d   :  { %59 = dma.hbm_to_vmem [thread:$0]  %s1469_s5, 16, %s57_s14, [#allocation9]  }
  0x2e   :  { %1265 = dma.done.wait [#allocation4], 128  }
  0x2f   :  { %1266 = vsyncadd [#allocation4], 4294967168 }
  0x30   :  { %1267 = dma.done.wait [#allocation6], 384  }
  0x31   :  { %1268 = vsyncadd [#allocation6], 4294966912 }
  0x32   :  { %1269 = dma.done.wait [#allocation9], 16  }
  0x33   :  { %1270 = vsyncadd [#allocation9], 4294967280  ;;  %v1277_v0 = vmov 0.0   ;;  %vm1278_vm0 = vmmov 0   ;;  %vm83_vm1 = vcmask 64512   ;;  %v72_v1 = vld [vmem:[#allocation5] sm:$0xff] }
  0x34   :  { %1048 = vmatprep.subr.mxu0 %v1277_v0  ;;  %1050 = vmatprep.mubr.msk.f32.mxu0 %vm1278_vm0, %v1277_v0  ;;  %v76_v2 = vld [vmem:[#allocation3] sm:$0xff]  ;;  %v1336_v3 = vld [vmem:[#allocation7 + $0x8] sm:$0xff]  ;;  %v1339_v4 = vld [vmem:[#allocation7] sm:$0xff]  ;;  %vm162_vm2 = vcmask 130048   ;;  %vm157_vm3 = vcmask 523264   ;;  %s1280_s20 = smov 16  }
  0x35   :  { %1053 = vmatprep.subr.mxu1 %v1277_v0  ;;  %1057 = vmatprep.mubr.msk.f32.mxu1 %vm1278_vm0, %v1277_v0  ;;  %v159_v5 = vld [vmem:[%s1465_s1] sm:$0x1]  ;;  %v1003_v6 = vld [vmem:[#allocation8] ss:$0 sm:$0xff]  ;;  %s1279_s1 = smov 96   ;;  %s1282_s21 = smov 80  }
  0x36   :  { %1049 = vmatpush3.msra.mxu0 %v72_v1  ;;  %1054 = vmatpush3.msra.mxu1 %v1336_v3  ;;  %v1007_v15 = vld [vmem:[%s1466_s2] ss:$0 sm:$0xff]  ;;  %s1281_s2 = smov 32   ;;  %vm273_vm4 = vcmask 122880  }
  0x37   :  { %1051 = vmatmul.mubr.msk.f32.vlgmr.msra.gmra.mxu0 %vm83_vm1, %v76_v2  ;;  %1055 = vmatprep.subr.mxu1 %v1277_v0 }
  0x38   :  { %1056 = vmatpush3.msra.mxu1 %v1339_v4  ;;  %1060 = vmatprep.subr.mxu0 %v1277_v0 }
  0x39   :  { %1058 = vmatmul.mubr.msk.f32.vlgmr.msra.gmra.mxu1 %vm162_vm2, %v159_v5  ;;  %1061 = vmatpush3.msra.mxu0 %v1336_v3 }
  0x3a   :  { %1062 = vmatprep.subr.mxu0 %v1277_v0  ;;  %1064 = vmatprep.mubr.msk.f32.mxu0 %vm1278_vm0, %v1277_v0 }
  0x3b   :  { %1063 = vmatpush3.msra.mxu0 %v1339_v4  ;;  %1067 = vmatprep.subr.mxu1 %v1277_v0 }
  0x3c   :  { %1068 = vmatpush3.msra.mxu1 %v1336_v3  ;;  %1071 = vmatprep.mubr.msk.f32.mxu1 %vm1278_vm0, %v1277_v0 }
  0x3d   :  { %1069 = vmatprep.subr.mxu1 %v1277_v0  ;;  %1074 = vmatprep.subr.mxu0 %v1277_v0 }
  0x3e   :  { %1070 = vmatpush3.msra.mxu1 %v1339_v4 }
  0x3f   :  { %1081 = vmatprep.subr.mxu1 %v1277_v0 }
  0xf7   :  { %v153_v7 = vpop.f32.mrf.mxu0 }
  0xf8   :  { %v154_v8 = vadd.f32 %v1003_v6, %v153_v7 }
  0xf9   :  { %v1052_v9 = vpop.f32.mrf.mxu0  ;;  %v232_v10 = vpop.f32.mrf.mxu1 }
  0xfa   :  { %158 = vst.msk [vmem:[#allocation2] sm:$0xff] %vm157_vm3, %v154_v8 }
  0xfb   :  { %v1059_v11 = vpop.f32.mrf.mxu1 }
 0x101   :  { %v161_v12 = vld [vmem:[#allocation2] sm:$0x1]  ;;  %v275_v30 = vld [vmem:[#allocation2 + $0x1] sm:$0x1]  ;;  %v378_v48 = vld [vmem:[#allocation2 + $0x2] sm:$0x1] }
 0x102   :  { %v236_v13 = vadd.f32 %v232_v10, %v161_v12  ;;  %v481_v5 = vld [vmem:[#allocation2 + $0x3] sm:$0x1] }
 0x104   :  { %1121 = vtanh.f32 %v236_v13  ;;  %v1006_v16 = vmul.f32 -1.442695, %v236_v13 }
 0x106   :  { %1123 = vpow2.f32 %v1006_v16 }
 0x111   :  { %v1122_v14 = vpop.eup %1121 }
 0x112   :  { %254 = vrot.lane.b32.xlu0 %v1122_v14, %s1279_s1 }
 0x113   :  { %v1124_v17 = vpop.eup %1123 }
 0x114   :  { %v240_v18 = vadd.f32 1.0, %v1124_v17 }
 0x116   :  { %249 = vrot.lane.b32.xlu0 %v1007_v15, %s1280_s20  ;;  %1125 = vrcp.f32 %v240_v18 }
 0x123   :  { %v1126_v19 = vpop.eup %1125 }
 0x184   :  { %v255_v20 = vpop.permute.xlu0 %254 }
 0x185   :  { %v257_v21 = vmul.f32 %v1126_v19, %v255_v20 }
 0x187   :  { %259 = vrot.lane.b32.xlu1 %v257_v21, %s1280_s20 }
 0x188   :  { %v250_v22 = vpop.permute.xlu0 %249 }
 0x189   :  { %v252_v23 = vmul.f32 %v1126_v19, %v250_v22 }
 0x1f9   :  { %v260_v24 = vpop.permute.xlu1 %259 }
 0x1fa   :  { %v262_v25 = vadd.f32 %v260_v24, %v252_v23  ;;  %v584_v23 = vld [vmem:[#allocation2 + $0x4] sm:$0x1] }
 0x1fc   :  { %1127 = vtanh.f32 %v262_v25 }
 0x209   :  { %v1128_v26 = vpop.eup %1127 }
 0x20a   :  { %265 = vrot.lane.b32.xlu1 %v1128_v26, %s1281_s2 }
 0x27c   :  { %v266_v27 = vpop.permute.xlu1 %265 }
 0x27d   :  { %v268_v28 = vmul.f32 %v1126_v19, %v266_v27 }
 0x27f   :  { %270 = vrot.lane.b32.xlu0 %v268_v28, %s1282_s21 }
 0x2f1   :  { %v271_v29 = vpop.permute.xlu0 %270 }
 0x2f2   :  { %274 = vst.msk [vmem:[%s1470_s6] sm:$0x1] %vm273_vm4, %v271_v29  ;;  %1065 = vmatmul.mubr.msk.f32.vlgmr.msra.gmra.mxu0 %vm162_vm2, %v271_v29 }
 0x2f3   :  { %1075 = vmatpush3.msra.mxu0 %v1336_v3  ;;  %1078 = vmatprep.mubr.msk.f32.mxu0 %vm1278_vm0, %v1277_v0 }
 0x2f4   :  { %1076 = vmatprep.subr.mxu0 %v1277_v0 }
 0x2f5   :  { %1077 = vmatpush3.msra.mxu0 %v1339_v4 }
 0x2f6   :  { %1088 = vmatprep.subr.mxu0 %v1277_v0 }
 0x3b2   :  { %v344_v31 = vpop.f32.mrf.mxu0 }
 0x3b3   :  { %v348_v32 = vadd.f32 %v344_v31, %v275_v30 }
 0x3b4   :  { %v1066_v33 = vpop.f32.mrf.mxu0 }
 0x3b5   :  { %1129 = vtanh.f32 %v348_v32  ;;  %v1009_v35 = vmul.f32 -1.442695, %v348_v32 }
 0x3b7   :  { %1131 = vpow2.f32 %v1009_v35 }
 0x3c2   :  { %v1130_v34 = vpop.eup %1129 }
 0x3c3   :  { %358 = vrot.lane.b32.xlu1 %v1130_v34, %s1279_s1 }
 0x3c4   :  { %v1132_v36 = vpop.eup %1131 }
 0x3c5   :  { %v352_v37 = vadd.f32 1.0, %v1132_v36 }
 0x3c7   :  { %1133 = vrcp.f32 %v352_v37 }
 0x3d4   :  { %v1134_v38 = vpop.eup %1133 }
 0x3d5   :  { %v356_v41 = vmul.f32 %v1134_v38, %v262_v25 }
 0x435   :  { %v359_v39 = vpop.permute.xlu1 %358 }
 0x436   :  { %v361_v40 = vmul.f32 %v1134_v38, %v359_v39 }
 0x438   :  { %363 = vrot.lane.b32.xlu0 %v361_v40, %s1280_s20 }
 0x4aa   :  { %v364_v42 = vpop.permute.xlu0 %363 }
 0x4ab   :  { %v366_v43 = vadd.f32 %v364_v42, %v356_v41  ;;  %v687_v41 = vld [vmem:[#allocation2 + $0x5] sm:$0x1] }
 0x4ad   :  { %1135 = vtanh.f32 %v366_v43 }
 0x4ba   :  { %v1136_v44 = vpop.eup %1135 }
 0x4bb   :  { %369 = vrot.lane.b32.xlu1 %v1136_v44, %s1281_s2 }
 0x52d   :  { %v370_v45 = vpop.permute.xlu1 %369 }
 0x52e   :  { %v372_v46 = vmul.f32 %v1134_v38, %v370_v45 }
 0x530   :  { %374 = vrot.lane.b32.xlu0 %v372_v46, %s1282_s21 }
 0x5a2   :  { %v375_v47 = vpop.permute.xlu0 %374 }
 0x5a3   :  { %377 = vst.msk [vmem:[%s1470_s6 + $0x1] sm:$0x1] %vm273_vm4, %v375_v47  ;;  %1072 = vmatmul.mubr.msk.f32.vlgmr.msra.gmra.mxu1 %vm162_vm2, %v375_v47 }
 0x5a4   :  { %1082 = vmatpush3.msra.mxu1 %v1336_v3  ;;  %1085 = vmatprep.mubr.msk.f32.mxu1 %vm1278_vm0, %v1277_v0 }
 0x5a5   :  { %1083 = vmatprep.subr.mxu1 %v1277_v0 }
 0x5a6   :  { %1084 = vmatpush3.msra.mxu1 %v1339_v4 }
 0x5a7   :  { %1095 = vmatprep.subr.mxu1 %v1277_v0 }
 0x663   :  { %v447_v49 = vpop.f32.mrf.mxu1 }
 0x664   :  { %v451_v50 = vadd.f32 %v447_v49, %v378_v48 }
 0x665   :  { %v1073_v51 = vpop.f32.mrf.mxu1 }
 0x666   :  { %1137 = vtanh.f32 %v451_v50  ;;  %v1011_v53 = vmul.f32 -1.442695, %v451_v50 }
 0x668   :  { %1139 = vpow2.f32 %v1011_v53 }
 0x673   :  { %v1138_v52 = vpop.eup %1137 }
 0x674   :  { %461 = vrot.lane.b32.xlu1 %v1138_v52, %s1279_s1 }
 0x675   :  { %v1140_v54 = vpop.eup %1139 }
 0x676   :  { %v455_v55 = vadd.f32 1.0, %v1140_v54 }
 0x678   :  { %1141 = vrcp.f32 %v455_v55 }
 0x685   :  { %v1142_v56 = vpop.eup %1141 }
 0x686   :  { %v459_v59 = vmul.f32 %v1142_v56, %v366_v43 }
 0x6e6   :  { %v462_v57 = vpop.permute.xlu1 %461 }
 0x6e7   :  { %v464_v58 = vmul.f32 %v1142_v56, %v462_v57 }
 0x6e9   :  { %466 = vrot.lane.b32.xlu0 %v464_v58, %s1280_s20 }
 0x75b   :  { %v467_v60 = vpop.permute.xlu0 %466 }
 0x75c   :  { %v469_v61 = vadd.f32 %v467_v60, %v459_v59 }
 0x75e   :  { %1143 = vtanh.f32 %v469_v61 }
 0x76b   :  { %v1144_v62 = vpop.eup %1143 }
 0x76c   :  { %472 = vrot.lane.b32.xlu1 %v1144_v62, %s1281_s2 }
 0x7de   :  { %v473_v63 = vpop.permute.xlu1 %472 }
 0x7df   :  { %v475_v1 = vmul.f32 %v1142_v56, %v473_v63  ;;  %v790_v56 = vld [vmem:[#allocation2 + $0x6] sm:$0x1] }
 0x7e1   :  { %477 = vrot.lane.b32.xlu0 %v475_v1, %s1282_s21 }
 0x853   :  { %v478_v2 = vpop.permute.xlu0 %477 }
 0x854   :  { %480 = vst.msk [vmem:[%s1470_s6 + $0x2] sm:$0x1] %vm273_vm4, %v478_v2  ;;  %1079 = vmatmul.mubr.msk.f32.vlgmr.msra.gmra.mxu0 %vm162_vm2, %v478_v2 }
 0x855   :  { %1089 = vmatpush3.msra.mxu0 %v1336_v3  ;;  %1092 = vmatprep.mubr.msk.f32.mxu0 %vm1278_vm0, %v1277_v0 }
 0x856   :  { %1090 = vmatprep.subr.mxu0 %v1277_v0 }
 0x857   :  { %1091 = vmatpush3.msra.mxu0 %v1339_v4 }
 0x858   :  { %1102 = vmatprep.subr.mxu0 %v1277_v0 }
 0x914   :  { %v550_v6 = vpop.f32.mrf.mxu0 }
 0x915   :  { %v554_v7 = vadd.f32 %v550_v6, %v481_v5 }
 0x916   :  { %v1080_v8 = vpop.f32.mrf.mxu0 }
 0x917   :  { %1145 = vtanh.f32 %v554_v7  ;;  %v1013_v10 = vmul.f32 -1.442695, %v554_v7 }
 0x919   :  { %1147 = vpow2.f32 %v1013_v10 }
 0x924   :  { %v1146_v9 = vpop.eup %1145 }
 0x925   :  { %564 = vrot.lane.b32.xlu1 %v1146_v9, %s1279_s1 }
 0x926   :  { %v1148_v11 = vpop.eup %1147 }
 0x927   :  { %v558_v12 = vadd.f32 1.0, %v1148_v11 }
 0x929   :  { %1149 = vrcp.f32 %v558_v12 }
 0x936   :  { %v1150_v13 = vpop.eup %1149 }
 0x937   :  { %v562_v16 = vmul.f32 %v1150_v13, %v469_v61 }
 0x997   :  { %v565_v14 = vpop.permute.xlu1 %564 }
 0x998   :  { %v567_v15 = vmul.f32 %v1150_v13, %v565_v14 }
 0x99a   :  { %569 = vrot.lane.b32.xlu0 %v567_v15, %s1280_s20 }
 0xa0c   :  { %v570_v17 = vpop.permute.xlu0 %569 }
 0xa0d   :  { %v572_v18 = vadd.f32 %v570_v17, %v562_v16 }
 0xa0f   :  { %1151 = vtanh.f32 %v572_v18 }
 0xa1c   :  { %v1152_v19 = vpop.eup %1151 }
 0xa1d   :  { %575 = vrot.lane.b32.xlu1 %v1152_v19, %s1281_s2 }
 0xa8f   :  { %v576_v20 = vpop.permute.xlu1 %575 }
 0xa90   :  { %v578_v21 = vmul.f32 %v1150_v13, %v576_v20  ;;  %v893_v13 = vld [vmem:[#allocation2 + $0x7] sm:$0x1] }
 0xa92   :  { %580 = vrot.lane.b32.xlu0 %v578_v21, %s1282_s21 }
 0xb04   :  { %v581_v22 = vpop.permute.xlu0 %580 }
 0xb05   :  { %583 = vst.msk [vmem:[%s1470_s6 + $0x3] sm:$0x1] %vm273_vm4, %v581_v22  ;;  %1086 = vmatmul.mubr.msk.f32.vlgmr.msra.gmra.mxu1 %vm162_vm2, %v581_v22 }
 0xb06   :  { %1096 = vmatpush3.msra.mxu1 %v1336_v3  ;;  %1099 = vmatprep.mubr.msk.f32.mxu1 %vm1278_vm0, %v1277_v0 }
 0xb07   :  { %1097 = vmatprep.subr.mxu1 %v1277_v0 }
 0xb08   :  { %1098 = vmatpush3.msra.mxu1 %v1339_v4 }
 0xbc5   :  { %v653_v24 = vpop.f32.mrf.mxu1 }
 0xbc6   :  { %v657_v25 = vadd.f32 %v653_v24, %v584_v23 }
 0xbc7   :  { %v1087_v26 = vpop.f32.mrf.mxu1 }
 0xbc8   :  { %1153 = vtanh.f32 %v657_v25  ;;  %v1015_v28 = vmul.f32 -1.442695, %v657_v25 }
 0xbca   :  { %1155 = vpow2.f32 %v1015_v28 }
 0xbd5   :  { %v1154_v27 = vpop.eup %1153 }
 0xbd6   :  { %667 = vrot.lane.b32.xlu1 %v1154_v27, %s1279_s1 }
 0xbd7   :  { %v1156_v29 = vpop.eup %1155 }
 0xbd8   :  { %v661_v30 = vadd.f32 1.0, %v1156_v29 }
 0xbda   :  { %1157 = vrcp.f32 %v661_v30 }
 0xbe7   :  { %v1158_v31 = vpop.eup %1157 }
 0xbe8   :  { %v665_v34 = vmul.f32 %v1158_v31, %v572_v18 }
 0xc48   :  { %v668_v32 = vpop.permute.xlu1 %667 }
 0xc49   :  { %v670_v33 = vmul.f32 %v1158_v31, %v668_v32 }
 0xc4b   :  { %672 = vrot.lane.b32.xlu0 %v670_v33, %s1280_s20 }
 0xcbd   :  { %v673_v35 = vpop.permute.xlu0 %672 }
 0xcbe   :  { %v675_v36 = vadd.f32 %v673_v35, %v665_v34 }
 0xcc0   :  { %1159 = vtanh.f32 %v675_v36 }
 0xccd   :  { %v1160_v37 = vpop.eup %1159 }
 0xcce   :  { %678 = vrot.lane.b32.xlu1 %v1160_v37, %s1281_s2 }
 0xd40   :  { %v679_v38 = vpop.permute.xlu1 %678 }
 0xd41   :  { %v681_v39 = vmul.f32 %v1158_v31, %v679_v38 }
 0xd43   :  { %683 = vrot.lane.b32.xlu0 %v681_v39, %s1282_s21 }
 0xdb5   :  { %v684_v40 = vpop.permute.xlu0 %683 }
 0xdb6   :  { %686 = vst.msk [vmem:[%s1470_s6 + $0x4] sm:$0x1] %vm273_vm4, %v684_v40  ;;  %1093 = vmatmul.mubr.msk.f32.vlgmr.msra.gmra.mxu0 %vm162_vm2, %v684_v40 }
 0xdb7   :  { %1103 = vmatpush3.msra.mxu0 %v1336_v3  ;;  %1106 = vmatprep.mubr.msk.f32.mxu0 %vm1278_vm0, %v1277_v0 }
 0xdb8   :  { %1104 = vmatprep.subr.mxu0 %v1277_v0 }
 0xdb9   :  { %1105 = vmatpush3.msra.mxu0 %v1339_v4 }
 0xe76   :  { %v756_v42 = vpop.f32.mrf.mxu0 }
 0xe77   :  { %v760_v43 = vadd.f32 %v756_v42, %v687_v41 }
 0xe78   :  { %v1094_v44 = vpop.f32.mrf.mxu0 }
 0xe79   :  { %1161 = vtanh.f32 %v760_v43  ;;  %v1017_v46 = vmul.f32 -1.442695, %v760_v43 }
 0xe7b   :  { %1163 = vpow2.f32 %v1017_v46 }
 0xe86   :  { %v1162_v45 = vpop.eup %1161 }
 0xe87   :  { %770 = vrot.lane.b32.xlu1 %v1162_v45, %s1279_s1 }
 0xe88   :  { %v1164_v47 = vpop.eup %1163 }
 0xe89   :  { %v764_v48 = vadd.f32 1.0, %v1164_v47 }
 0xe8b   :  { %1165 = vrcp.f32 %v764_v48 }
 0xe98   :  { %v1166_v3 = vpop.eup %1165 }
 0xe99   :  { %v768_v0 = vmul.f32 %v1166_v3, %v675_v36 }
 0xef9   :  { %v771_v49 = vpop.permute.xlu1 %770 }
 0xefa   :  { %v773_v50 = vmul.f32 %v1166_v3, %v771_v49 }
 0xefc   :  { %775 = vrot.lane.b32.xlu0 %v773_v50, %s1280_s20 }
 0xf6e   :  { %v776_v4 = vpop.permute.xlu0 %775 }
 0xf6f   :  { %v778_v51 = vadd.f32 %v776_v4, %v768_v0 }
 0xf71   :  { %1167 = vtanh.f32 %v778_v51 }
 0xf7e   :  { %v1168_v52 = vpop.eup %1167 }
 0xf7f   :  { %781 = vrot.lane.b32.xlu1 %v1168_v52, %s1281_s2 }
 0xff1   :  { %v782_v53 = vpop.permute.xlu1 %781 }
 0xff2   :  { %v784_v54 = vmul.f32 %v1166_v3, %v782_v53 }
 0xff4   :  { %786 = vrot.lane.b32.xlu0 %v784_v54, %s1282_s21 }
0x1066   :  { %v787_v55 = vpop.permute.xlu0 %786 }
0x1067   :  { %789 = vst.msk [vmem:[%s1470_s6 + $0x5] sm:$0x1] %vm273_vm4, %v787_v55  ;;  %1100 = vmatmul.mubr.msk.f32.vlgmr.msra.gmra.mxu1 %vm162_vm2, %v787_v55 }
0x1127   :  { %v859_v57 = vpop.f32.mrf.mxu1 }
0x1128   :  { %v863_v58 = vadd.f32 %v859_v57, %v790_v56 }
0x1129   :  { %v1101_v59 = vpop.f32.mrf.mxu1 }
0x112a   :  { %1169 = vtanh.f32 %v863_v58  ;;  %v1019_v61 = vmul.f32 -1.442695, %v863_v58 }
0x112c   :  { %1171 = vpow2.f32 %v1019_v61 }
0x1137   :  { %v1170_v60 = vpop.eup %1169 }
0x1138   :  { %873 = vrot.lane.b32.xlu1 %v1170_v60, %s1279_s1 }
0x1139   :  { %v1172_v62 = vpop.eup %1171 }
0x113a   :  { %v867_v63 = vadd.f32 1.0, %v1172_v62 }
0x113c   :  { %1173 = vrcp.f32 %v867_v63 }
0x1149   :  { %v1174_v1 = vpop.eup %1173 }
0x114a   :  { %v871_v6 = vmul.f32 %v1174_v1, %v778_v51 }
0x11aa   :  { %v874_v2 = vpop.permute.xlu1 %873 }
0x11ab   :  { %v876_v5 = vmul.f32 %v1174_v1, %v874_v2 }
0x11ad   :  { %878 = vrot.lane.b32.xlu0 %v876_v5, %s1280_s20 }
0x121f   :  { %v879_v7 = vpop.permute.xlu0 %878 }
0x1220   :  { %v881_v8 = vadd.f32 %v879_v7, %v871_v6 }
0x1222   :  { %1175 = vtanh.f32 %v881_v8 }
0x122f   :  { %v1176_v9 = vpop.eup %1175 }
0x1230   :  { %884 = vrot.lane.b32.xlu1 %v1176_v9, %s1281_s2 }
0x12a2   :  { %v885_v10 = vpop.permute.xlu1 %884 }
0x12a3   :  { %v887_v11 = vmul.f32 %v1174_v1, %v885_v10 }
0x12a5   :  { %889 = vrot.lane.b32.xlu0 %v887_v11, %s1282_s21 }
0x1317   :  { %v890_v12 = vpop.permute.xlu0 %889 }
0x1318   :  { %892 = vst.msk [vmem:[%s1470_s6 + $0x6] sm:$0x1] %vm273_vm4, %v890_v12  ;;  %1107 = vmatmul.mubr.msk.f32.vlgmr.msra.gmra.mxu0 %vm162_vm2, %v890_v12 }
0x13d8   :  { %v962_v14 = vpop.f32.mrf.mxu0 }
0x13d9   :  { %v966_v15 = vadd.f32 %v962_v14, %v893_v13 }
0x13da   :  { %v1108_v16 = vpop.f32.mrf.mxu0 }
0x13db   :  { %1177 = vtanh.f32 %v966_v15  ;;  %v1021_v18 = vmul.f32 -1.442695, %v966_v15 }
0x13dd   :  { %1179 = vpow2.f32 %v1021_v18 }
0x13e8   :  { %v1178_v17 = vpop.eup %1177 }
0x13e9   :  { %976 = vrot.lane.b32.xlu1 %v1178_v17, %s1279_s1 }
0x13ea   :  { %v1180_v19 = vpop.eup %1179 }
0x13eb   :  { %v970_v20 = vadd.f32 1.0, %v1180_v19 }
0x13ed   :  { %1181 = vrcp.f32 %v970_v20 }
0x13fa   :  { %v1182_v21 = vpop.eup %1181 }
0x13fb   :  { %v974_v24 = vmul.f32 %v1182_v21, %v881_v8 }
0x145b   :  { %v977_v22 = vpop.permute.xlu1 %976 }
0x145c   :  { %v979_v23 = vmul.f32 %v1182_v21, %v977_v22 }
0x145e   :  { %981 = vrot.lane.b32.xlu0 %v979_v23, %s1280_s20 }
0x14d0   :  { %v982_v25 = vpop.permute.xlu0 %981 }
0x14d1   :  { %v984_v26 = vadd.f32 %v982_v25, %v974_v24 }
0x14d3   :  { %1183 = vtanh.f32 %v984_v26 }
0x14e0   :  { %v1184_v27 = vpop.eup %1183 }
0x14e1   :  { %987 = vrot.lane.b32.xlu1 %v1184_v27, %s1281_s2 }
0x1553   :  { %v988_v28 = vpop.permute.xlu1 %987 }
0x1554   :  { %v990_v29 = vmul.f32 %v1182_v21, %v988_v28 }
0x1556   :  { %992 = vrot.lane.b32.xlu0 %v990_v29, %s1282_s21 }
0x15c8   :  { %v993_v30 = vpop.permute.xlu0 %992 }
0x15c9   :  { %995 = vst.msk [vmem:[%s1470_s6 + $0x7] sm:$0x1] %vm273_vm4, %v993_v30 }
0x15ca   :  { %1000 = vsyncpa [#allocation4], 1 }
0x15cb   :  { %1001 = vsyncpa [#allocation6], 1 }
0x15cc   :  { %1002 = vsyncpa [#allocation9], 1 }

// kernel: feature_extraction_forward.3
= control target key start
LH: loop header
LB: loop body
LE: loop exit
PB: predicated region body
PF: predicated region fallthrough
CT: control target
= control target key end

     0   :  { %s1441_s0 = inlined_call_operand.vmem [shape: f32[128,24], index: 0, kind: input, shape index: {}]   ;;  %s1442_s1 = inlined_call_operand.vmem [shape: f32[8,16], index: 1, kind: input, shape index: {}]   ;;  %s1443_s2 = inlined_call_operand.hbm [shape: f32[24,32], index: 2, kind: input, shape index: {}]   ;;  %s1444_s3 = inlined_call_operand.hbm [shape: f32[16,32], index: 3, kind: input, shape index: {}]   ;;  %s1445_s4 = inlined_call_operand.vmem [shape: f32[1,32], index: 4, kind: input, shape index: {}]   ;;  %s1446_s5 = inlined_call_operand.vmem [shape: f32[32,16], index: 5, kind: input, shape index: {}]   ;;  %s1447_s6 = inlined_call_operand.vmem [shape: f32[1,16], index: 6, kind: input, shape index: {}]   ;;  %s1448_s7 = inlined_call_operand.vmem [shape: f32[16,1], index: 7, kind: input, shape index: {}]   ;;  %s1449_s8 = inlined_call_operand.<no memory space> [shape: f32[1,1], index: 8, kind: input, shape index: {}]   ;;  %s1450_s9 = inlined_call_operand.vmem [shape: f32[128,1], index: 9, kind: output, shape index: {}]  }
   0x1   :  { %v14_v0 = vstv %s1449_s8 }
   0x2   :  { %15 = vst [vmem:[#allocation2] sm:$0x1] %v14_v0 }
   0x3   :  { %16 = vsyncpa [#allocation4], 0 }
   0x4   :  { %17 = vsyncpa [#allocation6], 0  ;;  %s1177_s11 = smov [#allocation3]  }
   0x5   :  { %s27_s12 = sshll.u32 %s1177_s11, 4  ;;  %s28_s12 = int_to_ptr.vmem [resolvable:$true] %s27_s12 }
   0x6   :  { %s1141_s13 = scalar_lea.vmem %s28_s12, 384  ;;  %p1146_p1 = scmp.lt.s32.totalorder %s28_s12, %s28_s12 }
   0x7   :  { %p1142_p0 = scmp.ne.s32.totalorder %s28_s12, %s1141_s13  ;;  %p1147_p2 = scmp.lt.s32.totalorder %s1141_s13, %s1141_s13 }
   0x9   :  { %p1148_p3 = por %p1147_p2, %p1146_p1 }
   0xb   :  { %p1149_p4 = pnand %p1148_p3, %p1142_p0 }
   0xd   :  { %1152 = shalt.err (!%p1149_p4)
}
   0xe   :  { %s1178_s14 = smov 128   ;;  %s1179_s15 = smov 8  }
   0xf   :  { %33 = dma.hbm_to_vmem [thread:$0]  %s1443_s2, 384, %s28_s12, [#allocation4], %s1178_s14, %s1178_s14, %s1179_s15  }
  0x10   :  { %s1180_s8 = smov [#allocation5]  }
  0x11   :  { %s39_s18 = sshll.u32 %s1180_s8, 4  ;;  %s40_s18 = int_to_ptr.vmem [resolvable:$true] %s39_s18 }
  0x12   :  { %s1161_s19 = scalar_lea.vmem %s40_s18, 256  ;;  %p1166_p6 = scmp.lt.s32.totalorder %s40_s18, %s40_s18 }
  0x13   :  { %p1162_p5 = scmp.ne.s32.totalorder %s40_s18, %s1161_s19  ;;  %p1167_p7 = scmp.lt.s32.totalorder %s1161_s19, %s1161_s19 }
  0x15   :  { %p1168_p8 = por %p1167_p7, %p1166_p6 }
  0x17   :  { %p1169_p9 = pnand %p1168_p8, %p1162_p5 }
  0x19   :  { %1172 = shalt.err (!%p1169_p9)
}
  0x1a   :  { %45 = dma.hbm_to_vmem [thread:$0]  %s1444_s3, 256, %s40_s18, [#allocation6], %s1178_s14, %s1178_s14, %s1179_s15  }
  0x1b   :  { %1173 = dma.done.wait [#allocation4], 384  }
  0x1c   :  { %1174 = vsyncadd [#allocation4], 4294966912 }
  0x1d   :  { %1175 = dma.done.wait [#allocation6], 256  }
  0x1e   :  { %1176 = vsyncadd [#allocation6], 4294967040  ;;  %v1181_v1 = vmov 0.0   ;;  %vm1182_vm0 = vmmov 0   ;;  %v66_v2 = vld [vmem:[#allocation5 + $0x8] sm:$0xff]  ;;  %v64_v3 = vld [vmem:[#allocation3 + $0x10] sm:$0xff]  ;;  %v162_v32 = vlaneseq }
  0x1f   :  { %1023 = vmatprep.subr.mxu0 %v1181_v1  ;;  %1027 = vmatprep.mubr.msk.f32.mxu0 %vm1182_vm0, %v1181_v1  ;;  %v65_v4 = vld [vmem:[#allocation5] sm:$0xff]  ;;  %v63_v5 = vld [vmem:[#allocation3 + $0x8] sm:$0xff]  ;;  %vm83_vm1 = vcmask 130048   ;;  %v62_v7 = vld [vmem:[#allocation3] sm:$0xff]  ;;  %vm263_vm2 = vcmask 195584   ;;  %vm479_vm3 = vcmask 261120  }
  0x20   :  { %1024 = vmatpush3.msra.mxu0 %v66_v2  ;;  %1120 = vmatprep.subr.mxu1 %v64_v3  ;;  %v76_v6 = vld [vmem:[%s1442_s1] sm:$0xff]  ;;  %v253_v8 = vld [vmem:[%s1441_s0 + $0x30] sm:$0xff]  ;;  %v254_v9 = vld [vmem:[%s1441_s0 + $0x38] sm:$0xff]  ;;  %v1183_v30 = vmov 1966171168   ;;  %v163_v34 = vshrl.u32 %v162_v32, 7 }
  0x21   :  { %1025 = vmatprep.subr.mxu0 %v1181_v1  ;;  %1123 = vmatpush3.msra.mxu1 %v64_v3  ;;  %v247_v10 = vld [vmem:[%s1441_s0] sm:$0xff]  ;;  %v248_v12 = vld [vmem:[%s1441_s0 + $0x8] sm:$0xff]  ;;  %v249_v14 = vld [vmem:[%s1441_s0 + $0x10] sm:$0xff]  ;;  %v160_v31 = vunpack.c.l.s4 %v1183_v30  ;;  %vm888_vm4 = vcmask 7168  }
  0x22   :  { %1026 = vmatpush3.msra.mxu0 %v65_v4  ;;  %1121 = vmatprep.subr.mxu1 %v63_v5  ;;  %v255_v11 = vld [vmem:[%s1441_s0 + $0x40] sm:$0xff]  ;;  %v256_v13 = vld [vmem:[%s1441_s0 + $0x48] sm:$0xff]  ;;  %v257_v15 = vld [vmem:[%s1441_s0 + $0x50] sm:$0xff]  ;;  %v1332_v41 = vsub.s32 0, %v163_v34 }
  0x23   :  { %1028 = vmatmul.mubr.msk.f32.vlgmr.msra.gmra.mxu0 %vm83_vm1, %v76_v6  ;;  %1030 = vmatprep.subr.mxu0 %v64_v3  ;;  %v250_v16 = vld [vmem:[%s1441_s0 + $0x18] sm:$0xff]  ;;  %v251_v18 = vld [vmem:[%s1441_s0 + $0x20] sm:$0xff]  ;;  %v252_v20 = vld [vmem:[%s1441_s0 + $0x28] sm:$0xff]  ;;  %v161_v33 = vunpack.c.0.s8 %v160_v31 }
  0x24   :  { %1124 = vmatpush3.msra.mxu1 %v63_v5  ;;  %1031 = vmatpush3.msra.mxu0 %v64_v3  ;;  %v258_v17 = vld [vmem:[%s1441_s0 + $0x58] sm:$0xff]  ;;  %v259_v19 = vld [vmem:[%s1441_s0 + $0x60] sm:$0xff]  ;;  %v260_v21 = vld [vmem:[%s1441_s0 + $0x68] sm:$0xff] }
  0x25   :  { %1122 = vmatprep.subr.mxu1 %v62_v7  ;;  %1032 = vmatprep.subr.mxu0 %v63_v5  ;;  %v261_v22 = vld [vmem:[%s1441_s0 + $0x70] sm:$0xff]  ;;  %v262_v23 = vld [vmem:[%s1441_s0 + $0x78] sm:$0xff]  ;;  %v69_v26 = vld [vmem:[%s1446_s5 + $0x8] sm:$0xff]  ;;  %v164_v36 = vsub.s32 %v161_v33, %v163_v34 }
  0x26   :  { %1125 = vmatpush3.msra.mxu1 %v62_v7  ;;  %1045 = vmatprep.mubr.msk.f32.mxu1 %vm263_vm2, %v253_v8  ;;  %v71_v24 = vld [vmem:[%s1446_s5 + $0x18] sm:$0xff]  ;;  %v70_v25 = vld [vmem:[%s1446_s5 + $0x10] sm:$0xff]  ;;  %v68_v27 = vld [vmem:[%s1446_s5] sm:$0xff] }
  0x27   :  { %1033 = vmatpush3.msra.mxu0 %v63_v5  ;;  %1046 = vmatmul.mubr.msk.f32.vlgmr.msra.gmra.mxu1 %vm263_vm2, %v254_v9  ;;  %v74_v28 = vld [vmem:[%s1448_s7 + $0x8] sm:$0xff]  ;;  %v73_v29 = vld [vmem:[%s1448_s7] sm:$0xff] }
  0x28   :  { %1034 = vmatprep.subr.mxu0 %v62_v7  ;;  %1036 = vmatprep.mubr.msk.f32.mxu0 %vm263_vm2, %v247_v10  ;;  %v911_v35 = vld [vmem:[%s1445_s4] ss:$0 sm:$0xff] }
  0x29   :  { %1035 = vmatpush3.msra.mxu0 %v62_v7  ;;  %1048 = vmatprep.mubr.msk.f32.mxu1 %vm263_vm2, %v255_v11 }
  0x2a   :  { %1037 = vmatmul.mubr.msk.f32.vlgmr.msra.gmra.mxu0 %vm263_vm2, %v248_v12  ;;  %1060 = vmatprep.subr.mxu0 %v71_v24 }
  0x2b   :  { %1049 = vmatmul.mubr.msk.f32.gmra.mxu1 %vm263_vm2, %v256_v13  ;;  %1039 = vmatprep.mubr.msk.f32.mxu0 %vm263_vm2, %v249_v14 }
  0x2c   :  { %1051 = vmatprep.mubr.msk.f32.mxu1 %vm263_vm2, %v257_v15  ;;  %1061 = vmatpush3.msra.mxu0 %v71_v24 }
  0x2d   :  { %1062 = vmatprep.subr.mxu0 %v70_v25  ;;  %1092 = vmatprep.subr.mxu1 %v74_v28 }
  0x2e   :  { %1040 = vmatmul.mubr.msk.f32.gmra.mxu0 %vm263_vm2, %v250_v16  ;;  %1093 = vmatpush3.msra.mxu1 %v74_v28 }
  0x2f   :  { %1052 = vmatmul.mubr.msk.f32.gmra.mxu1 %vm263_vm2, %v258_v17  ;;  %1042 = vmatprep.mubr.msk.f32.mxu0 %vm263_vm2, %v251_v18 }
  0x30   :  { %1054 = vmatprep.mubr.msk.f32.mxu1 %vm263_vm2, %v259_v19  ;;  %1063 = vmatpush3.msra.mxu0 %v70_v25 }
  0x31   :  { %1064 = vmatprep.subr.mxu0 %v69_v26  ;;  %1094 = vmatprep.subr.mxu1 %v73_v29 }
  0x32   :  { %1043 = vmatmul.mubr.msk.f32.gmra.mxu0 %vm263_vm2, %v252_v20  ;;  %1095 = vmatpush3.msra.mxu1 %v73_v29 }
  0x33   :  { %1055 = vmatmul.mubr.msk.f32.gmra.mxu1 %vm263_vm2, %v260_v21  ;;  %1065 = vmatpush3.msra.mxu0 %v69_v26 }
  0x34   :  { %1057 = vmatprep.mubr.msk.f32.mxu1 %vm263_vm2, %v261_v22  ;;  %1066 = vmatprep.subr.mxu0 %v68_v27 }
  0x35   :  { %1067 = vmatpush3.msra.mxu0 %v68_v27 }
  0x37   :  { %1058 = vmatmul.mubr.msk.f32.gmra.mxu1 %vm263_vm2, %v262_v23 }
  0xe3   :  { %v153_v37 = vpop.f32.mrf.mxu0 }
  0xe4   :  { %v154_v38 = vadd.f32 %v911_v35, %v153_v37 }
  0xe5   :  { %v1029_v39 = vpop.f32.mrf.mxu0 }
  0xe6   :  { %v165_v40 = vrot.slane %v154_v38, %v164_v36  ;;  %v158_v45 = vcombine.high %v154_v38, %v154_v38 }
  0xe7   :  { %v1047_v42 = vpop.f32.mrf.mxu1 }
  0xe8   :  { %v173_v43 = vcombine.high %v165_v40, %v165_v40  ;;  %v181_v44 = vrot.slane %v165_v40, %v164_v36  ;;  %v172_v54 = vrot.slane %v158_v45, %v164_v36 }
  0xe9   :  { %v408_v46 = vpop.f32.mrf.mxu1 }
  0xea   :  { %v195_v47 = vrot.slane %v173_v43, %v164_v36  ;;  %v210_v48 = vrot.slane %v181_v44, %v1332_v41  ;;  %v1038_v49 = vpop.f32.mrf.mxu0  ;;  %v203_v60 = vcombine.high %v181_v44, %v181_v44  ;;  %v188_v2 = vrot.slane %v172_v54, %v164_v36 }
  0xeb   :  { %v1050_v50 = vpop.f32.mrf.mxu1  ;;  %v174_v3 = vcombine.high %v172_v54, %v172_v54 }
  0xec   :  { %v384_v51 = vadd.f32 %v1038_v49, %v210_v48  ;;  %v378_v52 = vpop.f32.mrf.mxu0  ;;  %v214_v53 = vrot.slane %v195_v47, %v1332_v41  ;;  %v205_v55 = vcombine.high %v195_v47, %v195_v47  ;;  %v218_v6 = vrot.slane %v203_v60, %v1332_v41 }
  0xed   :  { %v379_v56 = vadd.f32 %v378_v52, %v210_v48  ;;  %v418_v57 = vpop.f32.mrf.mxu1  ;;  %v226_v13 = vrot.slane %v188_v2, %v1332_v41  ;;  %v202_v14 = vrot.slane %v174_v3, %v164_v36  ;;  %v204_v24 = vcombine.high %v188_v2, %v188_v2 }
  0xee   :  { %v458_v58 = vmax.f32 %v384_v51, 0.0  ;;  %v1041_v59 = vpop.f32.mrf.mxu0  ;;  %v222_v1 = vrot.slane %v205_v55, %v1332_v41 }
  0xef   :  { %v457_v61 = vmax.f32 %v379_v56, 0.0  ;;  %v1053_v62 = vpop.f32.mrf.mxu1  ;;  %v394_v63 = vadd.f32 %v1041_v59, %v214_v53  ;;  %v419_v21 = vadd.f32 %v418_v57, %v226_v13  ;;  %v230_v22 = vrot.slane %v202_v14, %v1332_v41 }
  0xf0   :  { %v388_v0 = vpop.f32.mrf.mxu0  ;;  %v409_v12 = vadd.f32 %v408_v46, %v222_v1  ;;  %v414_v18 = vadd.f32 %v1047_v42, %v222_v1  ;;  %v424_v26 = vadd.f32 %v1050_v50, %v226_v13  ;;  %v234_v30 = vrot.slane %v204_v24, %v1332_v41 }
  0xf1   :  { %v389_v4 = vadd.f32 %v388_v0, %v214_v53  ;;  %1068 = vmatprep.mubr.msk.f32.mxu0 %vm479_vm3, %v457_v61  ;;  %v428_v5 = vpop.f32.mrf.mxu1  ;;  %v460_v9 = vmax.f32 %v394_v63, 0.0  ;;  %v465_v27 = vmax.f32 %v419_v21, 0.0  ;;  %v206_v31 = vcombine.high %v202_v14, %v202_v14 }
  0xf2   :  { %v1044_v7 = vpop.f32.mrf.mxu0  ;;  %1069 = vmatmul.mubr.msk.f32.vlgmr.msra.gmra.mxu0 %vm479_vm3, %v458_v58  ;;  %v463_v20 = vmax.f32 %v409_v12, 0.0  ;;  %v464_v25 = vmax.f32 %v414_v18, 0.0  ;;  %v429_v28 = vadd.f32 %v428_v5, %v230_v22  ;;  %v466_v32 = vmax.f32 %v424_v26, 0.0 }
  0xf3   :  { %v459_v8 = vmax.f32 %v389_v4, 0.0  ;;  %v404_v10 = vadd.f32 %v1044_v7, %v218_v6  ;;  %v1056_v16 = vpop.f32.mrf.mxu1  ;;  %v434_v33 = vadd.f32 %v1053_v62, %v230_v22  ;;  %v238_v37 = vrot.slane %v206_v31, %v1332_v41  ;;  %v929_v41 = vld [vmem:[%s1447_s6] ss:$0 sm:$0xff] }
  0xf4   :  { %v398_v11 = vpop.f32.mrf.mxu0  ;;  %v467_v34 = vmax.f32 %v429_v28, 0.0  ;;  %v444_v39 = vadd.f32 %v1056_v16, %v234_v30  ;;  %v946_v31 = vld [vmem:[#allocation2] ss:$0 sm:$0xff] }
  0xf5   :  { %v399_v15 = vadd.f32 %v398_v11, %v218_v6  ;;  %1071 = vmatprep.mubr.msk.f32.mxu0 %vm479_vm3, %v459_v8  ;;  %v462_v19 = vmax.f32 %v404_v10, 0.0  ;;  %v438_v23 = vpop.f32.mrf.mxu1  ;;  %v468_v38 = vmax.f32 %v434_v33, 0.0 }
  0xf6   :  { %1072 = vmatmul.mubr.msk.f32.gmra.mxu0 %vm479_vm3, %v460_v9  ;;  %v439_v35 = vadd.f32 %v438_v23, %v234_v30  ;;  %v470_v43 = vmax.f32 %v444_v39, 0.0 }
  0xf7   :  { %v461_v17 = vmax.f32 %v399_v15, 0.0  ;;  %v1059_v29 = vpop.f32.mrf.mxu1 }
  0xf8   :  { %v469_v40 = vmax.f32 %v439_v35, 0.0  ;;  %v454_v44 = vadd.f32 %v1059_v29, %v238_v37 }
  0xf9   :  { %1074 = vmatprep.mubr.msk.f32.mxu0 %vm479_vm3, %v461_v17  ;;  %v448_v36 = vpop.f32.mrf.mxu1 }
  0xfa   :  { %1075 = vmatmul.mubr.msk.f32.gmra.mxu0 %vm479_vm3, %v462_v19  ;;  %v449_v42 = vadd.f32 %v448_v36, %v238_v37  ;;  %v472_v46 = vmax.f32 %v454_v44, 0.0 }
  0xfb   :  { %1077 = vmatprep.mubr.msk.f32.mxu0 %vm479_vm3, %v463_v20 }
  0xfc   :  { %v471_v45 = vmax.f32 %v449_v42, 0.0 }
  0xfe   :  { %1078 = vmatmul.mubr.msk.f32.gmra.mxu0 %vm479_vm3, %v464_v25 }
  0xff   :  { %1080 = vmatprep.mubr.msk.f32.mxu0 %vm479_vm3, %v465_v27 }
 0x102   :  { %1081 = vmatmul.mubr.msk.f32.gmra.mxu0 %vm479_vm3, %v466_v32 }
 0x103   :  { %1083 = vmatprep.mubr.msk.f32.mxu0 %vm479_vm3, %v467_v34 }
 0x106   :  { %1084 = vmatmul.mubr.msk.f32.gmra.mxu0 %vm479_vm3, %v468_v38 }
 0x107   :  { %1086 = vmatprep.mubr.msk.f32.mxu0 %vm479_vm3, %v469_v40 }
 0x10a   :  { %1087 = vmatmul.mubr.msk.f32.gmra.mxu0 %vm479_vm3, %v470_v43 }
 0x10b   :  { %1089 = vmatprep.mubr.msk.f32.mxu0 %vm479_vm3, %v471_v45 }
 0x10e   :  { %1090 = vmatmul.mubr.msk.f32.gmra.mxu0 %vm479_vm3, %v472_v46 }
 0x1b2   :  { %v1070_v47 = vpop.f32.mrf.mxu0 }
 0x1b3   :  { %v600_v48 = vadd.f32 %v1070_v47, %v929_v41 }
 0x1b4   :  { %v594_v49 = vpop.f32.mrf.mxu0 }
 0x1b5   :  { %v595_v50 = vadd.f32 %v929_v41, %v594_v49  ;;  %v674_v53 = vmax.f32 %v600_v48, 0.0 }
 0x1b6   :  { %v1073_v51 = vpop.f32.mrf.mxu0 }
 0x1b7   :  { %v673_v52 = vmax.f32 %v595_v50, 0.0  ;;  %v610_v54 = vadd.f32 %v1073_v51, %v929_v41 }
 0x1b8   :  { %v604_v55 = vpop.f32.mrf.mxu0 }
 0x1b9   :  { %v605_v56 = vadd.f32 %v929_v41, %v604_v55  ;;  %1096 = vmatprep.mubr.msk.f32.mxu1 %vm83_vm1, %v673_v52  ;;  %v676_v59 = vmax.f32 %v610_v54, 0.0 }
 0x1ba   :  { %v1076_v57 = vpop.f32.mrf.mxu0  ;;  %1097 = vmatmul.mubr.msk.f32.vlgmr.msra.gmra.mxu1 %vm83_vm1, %v674_v53 }
 0x1bb   :  { %v675_v58 = vmax.f32 %v605_v56, 0.0  ;;  %v620_v60 = vadd.f32 %v1076_v57, %v929_v41 }
 0x1bc   :  { %v614_v61 = vpop.f32.mrf.mxu0 }
 0x1bd   :  { %v615_v62 = vadd.f32 %v929_v41, %v614_v61  ;;  %1099 = vmatprep.mubr.msk.f32.mxu1 %vm83_vm1, %v675_v58  ;;  %v678_v1 = vmax.f32 %v620_v60, 0.0 }
 0x1be   :  { %v1079_v63 = vpop.f32.mrf.mxu0  ;;  %1100 = vmatmul.mubr.msk.f32.gmra.mxu1 %vm83_vm1, %v676_v59 }
 0x1bf   :  { %v677_v0 = vmax.f32 %v615_v62, 0.0  ;;  %v630_v2 = vadd.f32 %v1079_v63, %v929_v41 }
 0x1c0   :  { %v624_v3 = vpop.f32.mrf.mxu0 }
 0x1c1   :  { %v625_v4 = vadd.f32 %v929_v41, %v624_v3  ;;  %1102 = vmatprep.mubr.msk.f32.mxu1 %vm83_vm1, %v677_v0  ;;  %v680_v7 = vmax.f32 %v630_v2, 0.0 }
 0x1c2   :  { %v1082_v5 = vpop.f32.mrf.mxu0  ;;  %1103 = vmatmul.mubr.msk.f32.gmra.mxu1 %vm83_vm1, %v678_v1 }
 0x1c3   :  { %v679_v6 = vmax.f32 %v625_v4, 0.0  ;;  %v640_v8 = vadd.f32 %v1082_v5, %v929_v41 }
 0x1c4   :  { %v634_v9 = vpop.f32.mrf.mxu0 }
 0x1c5   :  { %v635_v10 = vadd.f32 %v929_v41, %v634_v9  ;;  %1105 = vmatprep.mubr.msk.f32.mxu1 %vm83_vm1, %v679_v6  ;;  %v682_v13 = vmax.f32 %v640_v8, 0.0 }
 0x1c6   :  { %v1085_v11 = vpop.f32.mrf.mxu0  ;;  %1106 = vmatmul.mubr.msk.f32.gmra.mxu1 %vm83_vm1, %v680_v7 }
 0x1c7   :  { %v681_v12 = vmax.f32 %v635_v10, 0.0  ;;  %v650_v14 = vadd.f32 %v1085_v11, %v929_v41 }
 0x1c8   :  { %v644_v15 = vpop.f32.mrf.mxu0 }
 0x1c9   :  { %v645_v16 = vadd.f32 %v929_v41, %v644_v15  ;;  %1108 = vmatprep.mubr.msk.f32.mxu1 %vm83_vm1, %v681_v12  ;;  %v684_v19 = vmax.f32 %v650_v14, 0.0 }
 0x1ca   :  { %v1088_v17 = vpop.f32.mrf.mxu0  ;;  %1109 = vmatmul.mubr.msk.f32.gmra.mxu1 %vm83_vm1, %v682_v13 }
 0x1cb   :  { %v683_v18 = vmax.f32 %v645_v16, 0.0  ;;  %v660_v20 = vadd.f32 %v1088_v17, %v929_v41 }
 0x1cc   :  { %v654_v21 = vpop.f32.mrf.mxu0 }
 0x1cd   :  { %v655_v22 = vadd.f32 %v929_v41, %v654_v21  ;;  %1111 = vmatprep.mubr.msk.f32.mxu1 %vm83_vm1, %v683_v18  ;;  %v686_v25 = vmax.f32 %v660_v20, 0.0 }
 0x1ce   :  { %v1091_v23 = vpop.f32.mrf.mxu0  ;;  %1112 = vmatmul.mubr.msk.f32.gmra.mxu1 %vm83_vm1, %v684_v19 }
 0x1cf   :  { %v685_v24 = vmax.f32 %v655_v22, 0.0  ;;  %v670_v26 = vadd.f32 %v1091_v23, %v929_v41 }
 0x1d0   :  { %v664_v27 = vpop.f32.mrf.mxu0 }
 0x1d1   :  { %v665_v28 = vadd.f32 %v929_v41, %v664_v27  ;;  %1114 = vmatprep.mubr.msk.f32.mxu1 %vm83_vm1, %v685_v24  ;;  %v688_v30 = vmax.f32 %v670_v26, 0.0 }
 0x1d2   :  { %1115 = vmatmul.mubr.msk.f32.gmra.mxu1 %vm83_vm1, %v686_v25 }
 0x1d3   :  { %v687_v29 = vmax.f32 %v665_v28, 0.0 }
 0x1d5   :  { %1117 = vmatprep.mubr.msk.f32.mxu1 %vm83_vm1, %v687_v29 }
 0x1d6   :  { %1118 = vmatmul.mubr.msk.f32.gmra.mxu1 %vm83_vm1, %v688_v30 }
 0x27a   :  { %v1098_v32 = vpop.f32.mrf.mxu1 }
 0x27b   :  { %v815_v33 = vadd.f32 %v1098_v32, %v946_v31 }
 0x27c   :  { %v809_v34 = vpop.f32.mrf.mxu1 }
 0x27d   :  { %890 = vst.msk [vmem:[%s1450_s9 + $0x8] sm:$0xff] %vm888_vm4, %v815_v33  ;;  %v810_v35 = vadd.f32 %v946_v31, %v809_v34 }
 0x27e   :  { %v1101_v36 = vpop.f32.mrf.mxu1 }
 0x27f   :  { %889 = vst.msk [vmem:[%s1450_s9] sm:$0xff] %vm888_vm4, %v810_v35  ;;  %v825_v37 = vadd.f32 %v1101_v36, %v946_v31 }
 0x280   :  { %v819_v38 = vpop.f32.mrf.mxu1 }
 0x281   :  { %892 = vst.msk [vmem:[%s1450_s9 + $0x18] sm:$0xff] %vm888_vm4, %v825_v37  ;;  %v820_v39 = vadd.f32 %v946_v31, %v819_v38 }
 0x282   :  { %v1104_v40 = vpop.f32.mrf.mxu1 }
 0x283   :  { %891 = vst.msk [vmem:[%s1450_s9 + $0x10] sm:$0xff] %vm888_vm4, %v820_v39  ;;  %v835_v42 = vadd.f32 %v1104_v40, %v946_v31 }
 0x284   :  { %v829_v43 = vpop.f32.mrf.mxu1 }
 0x285   :  { %894 = vst.msk [vmem:[%s1450_s9 + $0x28] sm:$0xff] %vm888_vm4, %v835_v42  ;;  %v830_v44 = vadd.f32 %v946_v31, %v829_v43 }
 0x286   :  { %v1107_v45 = vpop.f32.mrf.mxu1 }
 0x287   :  { %893 = vst.msk [vmem:[%s1450_s9 + $0x20] sm:$0xff] %vm888_vm4, %v830_v44  ;;  %v845_v46 = vadd.f32 %v1107_v45, %v946_v31 }
 0x288   :  { %v839_v41 = vpop.f32.mrf.mxu1 }
 0x289   :  { %896 = vst.msk [vmem:[%s1450_s9 + $0x38] sm:$0xff] %vm888_vm4, %v845_v46  ;;  %v840_v47 = vadd.f32 %v946_v31, %v839_v41 }
 0x28a   :  { %v1110_v48 = vpop.f32.mrf.mxu1 }
 0x28b   :  { %895 = vst.msk [vmem:[%s1450_s9 + $0x30] sm:$0xff] %vm888_vm4, %v840_v47  ;;  %v855_v49 = vadd.f32 %v1110_v48, %v946_v31 }
 0x28c   :  { %v849_v50 = vpop.f32.mrf.mxu1 }
 0x28d   :  { %898 = vst.msk [vmem:[%s1450_s9 + $0x48] sm:$0xff] %vm888_vm4, %v855_v49  ;;  %v850_v51 = vadd.f32 %v946_v31, %v849_v50 }
 0x28e   :  { %v1113_v52 = vpop.f32.mrf.mxu1 }
 0x28f   :  { %897 = vst.msk [vmem:[%s1450_s9 + $0x40] sm:$0xff] %vm888_vm4, %v850_v51  ;;  %v865_v53 = vadd.f32 %v1113_v52, %v946_v31 }
 0x290   :  { %v859_v54 = vpop.f32.mrf.mxu1 }
 0x291   :  { %900 = vst.msk [vmem:[%s1450_s9 + $0x58] sm:$0xff] %vm888_vm4, %v865_v53  ;;  %v860_v55 = vadd.f32 %v946_v31, %v859_v54 }
 0x292   :  { %v1116_v56 = vpop.f32.mrf.mxu1 }
 0x293   :  { %899 = vst.msk [vmem:[%s1450_s9 + $0x50] sm:$0xff] %vm888_vm4, %v860_v55  ;;  %v875_v57 = vadd.f32 %v1116_v56, %v946_v31 }
 0x294   :  { %v869_v58 = vpop.f32.mrf.mxu1 }
 0x295   :  { %902 = vst.msk [vmem:[%s1450_s9 + $0x68] sm:$0xff] %vm888_vm4, %v875_v57  ;;  %v870_v59 = vadd.f32 %v946_v31, %v869_v58 }
 0x296   :  { %v1119_v60 = vpop.f32.mrf.mxu1 }
 0x297   :  { %901 = vst.msk [vmem:[%s1450_s9 + $0x60] sm:$0xff] %vm888_vm4, %v870_v59  ;;  %v885_v61 = vadd.f32 %v1119_v60, %v946_v31 }
 0x298   :  { %v879_v62 = vpop.f32.mrf.mxu1 }
 0x299   :  { %904 = vst.msk [vmem:[%s1450_s9 + $0x78] sm:$0xff] %vm888_vm4, %v885_v61  ;;  %v880_v63 = vadd.f32 %v946_v31, %v879_v62 }
 0x29b   :  { %903 = vst.msk [vmem:[%s1450_s9 + $0x70] sm:$0xff] %vm888_vm4, %v880_v63 }
 0x29c   :  { %909 = vsyncpa [#allocation4], 1 }
 0x29d   :  { %910 = vsyncpa [#allocation6], 1 }

</bundles_post_ra>
